<compile_context>
chip_gen: v7x
topology: tpu7x:2x2x1
jax: 0.10.0
libtpu: 0.0.40
codegen_flags: <defaults>
</compile_context>

<pallas_src>
import functools

import jax
import jax.numpy as jnp
from jax import lax
from jax.experimental import pallas as pl
from jax.experimental.pallas import tpu as pltpu


def _round_up(n, m):
    return ((n + m - 1) // m) * m


# ----------------------------------------------------------------------------
# Pallas kernel: the whole CompoundEncoder forward, fused.
# ----------------------------------------------------------------------------
def _compound_encoder_kernel(ptT_ref, wcT_ref, bc_ref, w2_ref, bl_ref, o_ref,
                             *, n_batch, n_ch):
    """Fused conv(3x3,s2,p1)+ReLU -> flatten -> Linear+tanh for ALL keys.

    ptT_ref : (BB, Kp, Sp)  per-batch transposed im2col patches (all keys
                            concatenated + zero-padded along Kp; Sp % 128 == 0).
    wcT_ref : (Cp, Kp)      block-diagonal conv weights, (c_in,kh,kw)-flattened.
    bc_ref  : (Cp, 1)       conv bias (key-concatenated).
    w2_ref  : (Cp, Sp, Lp)  linear weights grouped per conv-output channel,
                            columns placed at each key's concat offset
                            (Lp % 128 == 0 -> lane-dense dots and stores).
    bl_ref  : (1, Lp)       linear bias (key-concatenated, zero padded).
    o_ref   : (BB, Lp)      tanh output; real latents are o[:, :L_total].
    """
    wcT = wcT_ref[...]                                   # (Cp, Kp)
    bc = bc_ref[...]                                     # (Cp, 1)

    # --- conv as GEMM, transposed so the big output dim (Sp) is lane-dense ---
    yts = []
    for b in range(n_batch):                             # static unroll (BB<=8)
        pt = ptT_ref[b]                                  # (Kp, Sp)
        yt = jnp.dot(wcT, pt, preferred_element_type=jnp.float32)   # (Cp, Sp)
        yts.append(jnp.maximum(yt + bc, 0.0))            # bias + ReLU, in vregs

    # --- linear layer: contract over (channel, spatial) with NO in-kernel
    #     reshape/relayout: one small lane-dense MXU dot per real conv-output
    #     channel.  This also realizes the NCHW flatten and the per-key concat,
    #     because w2 was pre-permuted/offset accordingly at construction time.
    z = jnp.zeros((n_batch, o_ref.shape[1]), jnp.float32)
    for c in range(n_ch):                                # static unroll (real C)
        yc = jnp.concatenate([yt[c:c + 1, :] for yt in yts], axis=0)  # (BB, Sp)
        z = z + jnp.dot(yc, w2_ref[c], preferred_element_type=jnp.float32)

    # Lp is a multiple of 128 -> unmasked, lane-dense output store.
    o_ref[...] = jnp.tanh(z + bl_ref[...]).astype(o_ref.dtype)


def _fused_compound_encode(ptT, wcT, bc, w2, bl, *, n_real_ch):
    """One pallas_call for the whole compound forward.  ptT: (B, Kp, Sp)."""
    B, Kp, Sp = ptT.shape
    Cp = wcT.shape[0]
    Lp = bl.shape[1]
    # Batch grid axis: shards across TensorCores (v7x megacore) when B is
    # large; for small B it degenerates to a single block.
    BB = 8 if (B >= 8 and B % 8 == 0) else B
    grid = (B // BB,)

    kernel = functools.partial(_compound_encoder_kernel,
                               n_batch=BB, n_ch=n_real_ch)
    return pl.pallas_call(
        kernel,
        out_shape=jax.ShapeDtypeStruct((B, Lp), jnp.float32),
        grid=grid,
        in_specs=[
            pl.BlockSpec((BB, Kp, Sp), lambda i: (i, 0, 0)),
            pl.BlockSpec((Cp, Kp), lambda i: (0, 0)),
            pl.BlockSpec((Cp, 1), lambda i: (0, 0)),
            pl.BlockSpec((Cp, Sp, Lp), lambda i: (0, 0, 0)),
            pl.BlockSpec((1, Lp), lambda i: (0, 0)),
        ],
        out_specs=pl.BlockSpec((BB, Lp), lambda i: (i, 0)),
        compiler_params=pltpu.CompilerParams(
            dimension_semantics=("parallel",)),
    )(ptT, wcT, bc, w2, bl)


# ----------------------------------------------------------------------------
# Host-side glue: im2col for Conv2d(kernel=3, stride=2, padding=1), NCHW input
# ----------------------------------------------------------------------------
def _im2col_nchw_3x3_s2_p1(x):
    """x: (B, C, H, W) -> (B, C*9, Ho*Wo).  Row (reduced) index ordered
    (c, kh, kw) to match torch's weight.reshape(C_out, C_in*9) flattening.
    Handles odd H/W correctly: Ho = (H+1)//2, Wo = (W+1)//2."""
    B, C, H, W = x.shape
    Ho, Wo = (H + 1) // 2, (W + 1) // 2
    xp = jnp.pad(x, ((0, 0), (0, 0), (1, 1), (1, 1)))
    taps = []
    for kh in range(3):
        for kw in range(3):
            taps.append(xp[:, :, kh:kh + 2 * Ho - 1:2, kw:kw + 2 * Wo - 1:2])
    p = jnp.stack(taps, axis=2)                  # (B, C, 9, Ho, Wo)
    return p.reshape(B, C * 9, Ho * Wo), Ho, Wo


# ----------------------------------------------------------------------------
# CompoundEncoder: dict in -> fused per-key encoders -> concat along axis=-1
# ----------------------------------------------------------------------------
class CompoundEncoder:
    def __init__(self, mapping_params):
        # mapping_params: (ordered) dict key -> params dict:
        #   conv_w (Cout, Cin, 3, 3), conv_b (Cout,),
        #   lin_w (L, Cout*Ho*Wo)  [torch NCHW flatten order], lin_b (L,)
        self.mapping = dict(mapping_params)

        metas, k_off, c_off, l_off, s_max = [], 0, 0, 0, 0
        for key, prm in self.mapping.items():
            cout, cin, kh, kw = prm["conv_w"].shape
            assert (kh, kw) == (3, 3), "this encoder uses 3x3 stride-2 convs"
            lat = prm["lin_w"].shape[0]
            S = prm["lin_w"].shape[1] // cout
            metas.append(dict(key=key, cin=cin, cout=cout, lat=lat, S=S,
                              k_off=k_off, c_off=c_off, l_off=l_off))
            k_off += cin * 9
            c_off += cout
            l_off += lat
            s_max = max(s_max, S)
        self._metas = metas
        self.latent_total = l_off
        self._c_total = c_off

        # Padded fused dims (zero padding is exact: zeros add nothing to dots).
        # Sublane (second-to-last) dims -> multiples of 8; lane (last) dims of
        # every in-kernel tensor -> multiples of 128 for unmasked, lane-dense
        # loads / MXU outputs / stores.
        self._Kp = _round_up(k_off, 8)
        self._Cp = _round_up(c_off, 8)
        self._Lp = _round_up(l_off, 128)
        self._Sp = _round_up(s_max, 128)

        # ---- fold all per-key weights into the fused operands, once ----
        wcT = jnp.zeros((self._Cp, self._Kp), jnp.float32)
        bc = jnp.zeros((self._Cp, 1), jnp.float32)
        w2 = jnp.zeros((self._Cp, self._Sp, self._Lp), jnp.float32)
        bl = jnp.zeros((1, self._Lp), jnp.float32)
        for m in metas:
            prm = self.mapping[m["key"]]
            co, ci, S, lat = m["cout"], m["cin"], m["S"], m["lat"]
            c0, k0, l0 = m["c_off"], m["k_off"], m["l_off"]
            wcT = wcT.at[c0:c0 + co, k0:k0 + ci * 9].set(
                prm["conv_w"].reshape(co, ci * 9).astype(jnp.float32))
            bc = bc.at[c0:c0 + co, 0].set(prm["conv_b"].astype(jnp.float32))
            # torch flatten is NCHW: lin_w[l, c*S + s] -> per-channel (S, L)
            # blocks, columns placed at this key's concat offset.  This fuses
            # the flatten permutation, the per-key linear and the final concat
            # into a single weight tensor (done once, host-side).  Columns at
            # padded spatial positions stay zero, so the ReLU(bias) values the
            # conv produces there contribute nothing.
            w2k = prm["lin_w"].reshape(lat, co, S).transpose(1, 2, 0)
            w2 = w2.at[c0:c0 + co, :S, l0:l0 + lat].set(w2k.astype(jnp.float32))
            bl = bl.at[0, l0:l0 + lat].set(prm["lin_b"].astype(jnp.float32))
        self._wcT, self._bc, self._w2, self._bl = wcT, bc, w2, bl

        self._forward = jax.jit(self._forward_impl)

    def _forward_impl(self, *xs):
        # im2col glue fuses into this jit; the only kernel launch is the
        # single pallas_call below.
        parts = []
        for m, xk in zip(self._metas, xs):
            p, _, _ = _im2col_nchw_3x3_s2_p1(xk)          # (B, cin*9, S)
            if m["S"] < self._Sp:
                p = jnp.pad(p, ((0, 0), (0, 0), (0, self._Sp - m["S"])))
            parts.append(p.astype(jnp.float32))
        ptT = jnp.concatenate(parts, axis=1)              # (B, sum cin*9, Sp)
        if ptT.shape[1] < self._Kp:
            ptT = jnp.pad(ptT, ((0, 0), (0, self._Kp - ptT.shape[1]), (0, 0)))
        z_pad = _fused_compound_encode(ptT, self._wcT, self._bc,
                                       self._w2, self._bl,
                                       n_real_ch=self._c_total)
        return z_pad[:, :self.latent_total]

    def __call__(self, x):
        # Mirror the {'x': ..., 'F': ...} unwrapping of the PyTorch module.
        if len(x.keys()) == 2 and "x" in x and "F" in x:
            x = x["x"]
        if set(x.keys()) != set(self.mapping.keys()):
            self_keys = ", ".join(self.mapping.keys())
            x_keys = ", ".join(x.keys())
            raise ValueError(f"expected keys ({self_keys}), got ({x_keys})")
        # TODO(synk): get_tracer()/get_backend() dispatch is host-side framework
        # glue with no device compute; the axis=-1 concatenation is produced
        # directly inside the fused kernel via each key's column offset.
        return self._forward(*[x[key] for key in self.mapping])


# ----------------------------------------------------------------------------
# Pure-JAX reference (lax.conv) for validation
# ----------------------------------------------------------------------------
def _encode_ref(x_nchw, params):
    wc, bc, wl, bl = (params["conv_w"], params["conv_b"],
                      params["lin_w"], params["lin_b"])
    y = lax.conv_general_dilated(
        x_nchw, wc, window_strides=(2, 2), padding=((1, 1), (1, 1)),
        dimension_numbers=("NCHW", "OIHW", "NCHW"))
    y = jnp.maximum(y + bc[None, :, None, None], 0.0)
    y = y.reshape(x_nchw.shape[0], -1)
    return jnp.tanh(y @ wl.T + bl)


# ----------------------------------------------------------------------------
# Deterministic parameter construction
# ----------------------------------------------------------------------------
def make_encoder_params(key, c_in, c_out, spatial, latent):
    ho = wo = (spatial + 1) // 2
    k1, k2, k3, k4 = jax.random.split(key, 4)
    return {
        "conv_w": 0.1 * jax.random.normal(k1, (c_out, c_in, 3, 3), jnp.float32),
        "conv_b": 0.1 * jax.random.normal(k2, (c_out,), jnp.float32),
        "lin_w": 0.05 * jax.random.normal(k3, (latent, c_out * ho * wo), jnp.float32),
        "lin_b": 0.05 * jax.random.normal(k4, (latent,), jnp.float32),
    }


if __name__ == "__main__":
    root = jax.random.PRNGKey(0)
    kpa, kpb, kxa, kxb = jax.random.split(root, 4)

    B, H, W = 2, 16, 16
    C_A, C_B = 4, 2
    C_OUT = 8
    LAT_A, LAT_B = 8, 6

    mapping = {
        "a": make_encoder_params(kpa, C_A, C_OUT, H, LAT_A),
        "b": make_encoder_params(kpb, C_B, C_OUT, H, LAT_B),
    }
    encoder = CompoundEncoder(mapping)

    x = {
        "a": jax.random.normal(kxa, (B, C_A, H, W), jnp.float32),
        "b": jax.random.normal(kxb, (B, C_B, H, W), jnp.float32),
    }

    z = jax.block_until_ready(encoder(x))
    assert z.shape == (B, LAT_A + LAT_B), z.shape

    # Also exercise the {'x': ..., 'F': ...} path of the original forward.
    z2 = jax.block_until_ready(encoder({"x": x, "F": None}))

    # Validate against a pure-JAX reference.
    z_ref = jnp.concatenate(
        [_encode_ref(x["a"], mapping["a"]), _encode_ref(x["b"], mapping["b"])],
        axis=-1)
    assert jnp.allclose(z, z_ref, atol=1e-4, rtol=1e-4), \
        float(jnp.abs(z - z_ref).max())
    assert jnp.allclose(z, z2)

    print("KERNEL_OK")
</pallas_src>

<mosaic_0001>
module attributes {stable_mosaic.version = 11 : i64} {
  func.func @_compound_encoder_kernel(%arg0: i32, %arg1: memref<2x56x128xf32, #tpu.memory_space<vmem>>, %arg2: memref<16x56xf32, #tpu.memory_space<vmem>>, %arg3: memref<16x1xf32, #tpu.memory_space<vmem>>, %arg4: memref<16x128x128xf32, #tpu.memory_space<vmem>>, %arg5: memref<1x128xf32, #tpu.memory_space<vmem>>, %arg6: memref<2x128xf32, #tpu.memory_space<vmem>>) attributes {dimension_semantics = [#tpu.dimension_semantics<parallel>], iteration_bounds = array<i64: 1>, scalar_prefetch = 0 : i64, scratch_operands = 0 : i64, tpu.core_type = #tpu.core_type<tc>, window_params = [{transform_indices = @transform_0, window_bounds = array<i64: 2, 56, 128>}, {pipeline_mode = #tpu.pipeline_mode<synchronous>, transform_indices = @transform_1, window_bounds = array<i64: 16, 56>}, {pipeline_mode = #tpu.pipeline_mode<synchronous>, transform_indices = @transform_2, window_bounds = array<i64: 16, 1>}, {pipeline_mode = #tpu.pipeline_mode<synchronous>, transform_indices = @transform_3, window_bounds = array<i64: 16, 128, 128>}, {pipeline_mode = #tpu.pipeline_mode<synchronous>, transform_indices = @transform_4, window_bounds = array<i64: 1, 128>}, {transform_indices = @transform_5, window_bounds = array<i64: 2, 128>}]} {
    %c0 = arith.constant 0 : index
    %c0_0 = arith.constant 0 : index
    %0 = vector.load %arg2[%c0, %c0_0] : memref<16x56xf32, #tpu.memory_space<vmem>>, vector<16x56xf32>
    %c0_1 = arith.constant 0 : index
    %c0_2 = arith.constant 0 : index
    %1 = vector.load %arg3[%c0_1, %c0_2] : memref<16x1xf32, #tpu.memory_space<vmem>>, vector<16x1xf32>
    %c0_3 = arith.constant 0 : index
    %c0_4 = arith.constant 0 : index
    %c0_5 = arith.constant 0 : index
    %2 = vector.load %arg1[%c0_3, %c0_4, %c0_5] : memref<2x56x128xf32, #tpu.memory_space<vmem>>, vector<1x56x128xf32>
    %3 = vector.shape_cast %2 : vector<1x56x128xf32> to vector<56x128xf32>
    %cst = arith.constant dense<0.000000e+00> : vector<16x128xf32>
    %4 = tpu.matmul %0, %3, %cst {dimension_numbers = #tpu.dot_dimension_numbers<[1], [0], [0], [1], [0, 0, 1, 1], [], []>} : vector<16x56xf32>, vector<56x128xf32>, vector<16x128xf32> -> vector<16x128xf32>
    %5 = vector.broadcast %1 : vector<16x1xf32> to vector<16x128xf32>
    %6 = arith.addf %4, %5 : vector<16x128xf32>
    %cst_6 = arith.constant 0.000000e+00 : f32
    %7 = vector.broadcast %cst_6 : f32 to vector<16x128xf32>
    %8 = arith.maximumf %6, %7 : vector<16x128xf32>
    %c1 = arith.constant 1 : index
    %c0_7 = arith.constant 0 : index
    %c0_8 = arith.constant 0 : index
    %9 = vector.load %arg1[%c1, %c0_7, %c0_8] : memref<2x56x128xf32, #tpu.memory_space<vmem>>, vector<1x56x128xf32>
    %10 = vector.shape_cast %9 : vector<1x56x128xf32> to vector<56x128xf32>
    %cst_9 = arith.constant dense<0.000000e+00> : vector<16x128xf32>
    %11 = tpu.matmul %0, %10, %cst_9 {dimension_numbers = #tpu.dot_dimension_numbers<[1], [0], [0], [1], [0, 0, 1, 1], [], []>} : vector<16x56xf32>, vector<56x128xf32>, vector<16x128xf32> -> vector<16x128xf32>
    %12 = vector.broadcast %1 : vector<16x1xf32> to vector<16x128xf32>
    %13 = arith.addf %11, %12 : vector<16x128xf32>
    %cst_10 = arith.constant 0.000000e+00 : f32
    %14 = vector.broadcast %cst_10 : f32 to vector<16x128xf32>
    %15 = arith.maximumf %13, %14 : vector<16x128xf32>
    %cst_11 = arith.constant 0.000000e+00 : f32
    %16 = vector.broadcast %cst_11 : f32 to vector<2x128xf32>
    %17 = vector.extract_strided_slice %8 {offsets = [0, 0], sizes = [1, 128], strides = [1, 1]} : vector<16x128xf32> to vector<1x128xf32>
    %18 = vector.extract_strided_slice %15 {offsets = [0, 0], sizes = [1, 128], strides = [1, 1]} : vector<16x128xf32> to vector<1x128xf32>
    %19 = tpu.concatenate %17, %18 in 0 : vector<1x128xf32>, vector<1x128xf32> -> vector<2x128xf32>
    %c0_12 = arith.constant 0 : index
    %c0_13 = arith.constant 0 : index
    %c0_14 = arith.constant 0 : index
    %20 = vector.load %arg4[%c0_12, %c0_13, %c0_14] : memref<16x128x128xf32, #tpu.memory_space<vmem>>, vector<1x128x128xf32>
    %21 = vector.shape_cast %20 : vector<1x128x128xf32> to vector<128x128xf32>
    %cst_15 = arith.constant dense<0.000000e+00> : vector<2x128xf32>
    %22 = tpu.matmul %19, %21, %cst_15 {dimension_numbers = #tpu.dot_dimension_numbers<[1], [0], [0], [1], [0, 0, 1, 1], [], []>} : vector<2x128xf32>, vector<128x128xf32>, vector<2x128xf32> -> vector<2x128xf32>
    %23 = arith.addf %16, %22 : vector<2x128xf32>
    %24 = vector.extract_strided_slice %8 {offsets = [1, 0], sizes = [1, 128], strides = [1, 1]} : vector<16x128xf32> to vector<1x128xf32>
    %25 = vector.extract_strided_slice %15 {offsets = [1, 0], sizes = [1, 128], strides = [1, 1]} : vector<16x128xf32> to vector<1x128xf32>
    %26 = tpu.concatenate %24, %25 in 0 : vector<1x128xf32>, vector<1x128xf32> -> vector<2x128xf32>
    %c1_16 = arith.constant 1 : index
    %c0_17 = arith.constant 0 : index
    %c0_18 = arith.constant 0 : index
    %27 = vector.load %arg4[%c1_16, %c0_17, %c0_18] : memref<16x128x128xf32, #tpu.memory_space<vmem>>, vector<1x128x128xf32>
    %28 = vector.shape_cast %27 : vector<1x128x128xf32> to vector<128x128xf32>
    %cst_19 = arith.constant dense<0.000000e+00> : vector<2x128xf32>
    %29 = tpu.matmul %26, %28, %cst_19 {dimension_numbers = #tpu.dot_dimension_numbers<[1], [0], [0], [1], [0, 0, 1, 1], [], []>} : vector<2x128xf32>, vector<128x128xf32>, vector<2x128xf32> -> vector<2x128xf32>
    %30 = arith.addf %23, %29 : vector<2x128xf32>
    %31 = vector.extract_strided_slice %8 {offsets = [2, 0], sizes = [1, 128], strides = [1, 1]} : vector<16x128xf32> to vector<1x128xf32>
    %32 = vector.extract_strided_slice %15 {offsets = [2, 0], sizes = [1, 128], strides = [1, 1]} : vector<16x128xf32> to vector<1x128xf32>
    %33 = tpu.concatenate %31, %32 in 0 : vector<1x128xf32>, vector<1x128xf32> -> vector<2x128xf32>
    %c2 = arith.constant 2 : index
    %c0_20 = arith.constant 0 : index
    %c0_21 = arith.constant 0 : index
    %34 = vector.load %arg4[%c2, %c0_20, %c0_21] : memref<16x128x128xf32, #tpu.memory_space<vmem>>, vector<1x128x128xf32>
    %35 = vector.shape_cast %34 : vector<1x128x128xf32> to vector<128x128xf32>
    %cst_22 = arith.constant dense<0.000000e+00> : vector<2x128xf32>
    %36 = tpu.matmul %33, %35, %cst_22 {dimension_numbers = #tpu.dot_dimension_numbers<[1], [0], [0], [1], [0, 0, 1, 1], [], []>} : vector<2x128xf32>, vector<128x128xf32>, vector<2x128xf32> -> vector<2x128xf32>
    %37 = arith.addf %30, %36 : vector<2x128xf32>
    %38 = vector.extract_strided_slice %8 {offsets = [3, 0], sizes = [1, 128], strides = [1, 1]} : vector<16x128xf32> to vector<1x128xf32>
    %39 = vector.extract_strided_slice %15 {offsets = [3, 0], sizes = [1, 128], strides = [1, 1]} : vector<16x128xf32> to vector<1x128xf32>
    %40 = tpu.concatenate %38, %39 in 0 : vector<1x128xf32>, vector<1x128xf32> -> vector<2x128xf32>
    %c3 = arith.constant 3 : index
    %c0_23 = arith.constant 0 : index
    %c0_24 = arith.constant 0 : index
    %41 = vector.load %arg4[%c3, %c0_23, %c0_24] : memref<16x128x128xf32, #tpu.memory_space<vmem>>, vector<1x128x128xf32>
    %42 = vector.shape_cast %41 : vector<1x128x128xf32> to vector<128x128xf32>
    %cst_25 = arith.constant dense<0.000000e+00> : vector<2x128xf32>
    %43 = tpu.matmul %40, %42, %cst_25 {dimension_numbers = #tpu.dot_dimension_numbers<[1], [0], [0], [1], [0, 0, 1, 1], [], []>} : vector<2x128xf32>, vector<128x128xf32>, vector<2x128xf32> -> vector<2x128xf32>
    %44 = arith.addf %37, %43 : vector<2x128xf32>
    %45 = vector.extract_strided_slice %8 {offsets = [4, 0], sizes = [1, 128], strides = [1, 1]} : vector<16x128xf32> to vector<1x128xf32>
    %46 = vector.extract_strided_slice %15 {offsets = [4, 0], sizes = [1, 128], strides = [1, 1]} : vector<16x128xf32> to vector<1x128xf32>
    %47 = tpu.concatenate %45, %46 in 0 : vector<1x128xf32>, vector<1x128xf32> -> vector<2x128xf32>
    %c4 = arith.constant 4 : index
    %c0_26 = arith.constant 0 : index
    %c0_27 = arith.constant 0 : index
    %48 = vector.load %arg4[%c4, %c0_26, %c0_27] : memref<16x128x128xf32, #tpu.memory_space<vmem>>, vector<1x128x128xf32>
    %49 = vector.shape_cast %48 : vector<1x128x128xf32> to vector<128x128xf32>
    %cst_28 = arith.constant dense<0.000000e+00> : vector<2x128xf32>
    %50 = tpu.matmul %47, %49, %cst_28 {dimension_numbers = #tpu.dot_dimension_numbers<[1], [0], [0], [1], [0, 0, 1, 1], [], []>} : vector<2x128xf32>, vector<128x128xf32>, vector<2x128xf32> -> vector<2x128xf32>
    %51 = arith.addf %44, %50 : vector<2x128xf32>
    %52 = vector.extract_strided_slice %8 {offsets = [5, 0], sizes = [1, 128], strides = [1, 1]} : vector<16x128xf32> to vector<1x128xf32>
    %53 = vector.extract_strided_slice %15 {offsets = [5, 0], sizes = [1, 128], strides = [1, 1]} : vector<16x128xf32> to vector<1x128xf32>
    %54 = tpu.concatenate %52, %53 in 0 : vector<1x128xf32>, vector<1x128xf32> -> vector<2x128xf32>
    %c5 = arith.constant 5 : index
    %c0_29 = arith.constant 0 : index
    %c0_30 = arith.constant 0 : index
    %55 = vector.load %arg4[%c5, %c0_29, %c0_30] : memref<16x128x128xf32, #tpu.memory_space<vmem>>, vector<1x128x128xf32>
    %56 = vector.shape_cast %55 : vector<1x128x128xf32> to vector<128x128xf32>
    %cst_31 = arith.constant dense<0.000000e+00> : vector<2x128xf32>
    %57 = tpu.matmul %54, %56, %cst_31 {dimension_numbers = #tpu.dot_dimension_numbers<[1], [0], [0], [1], [0, 0, 1, 1], [], []>} : vector<2x128xf32>, vector<128x128xf32>, vector<2x128xf32> -> vector<2x128xf32>
    %58 = arith.addf %51, %57 : vector<2x128xf32>
    %59 = vector.extract_strided_slice %8 {offsets = [6, 0], sizes = [1, 128], strides = [1, 1]} : vector<16x128xf32> to vector<1x128xf32>
    %60 = vector.extract_strided_slice %15 {offsets = [6, 0], sizes = [1, 128], strides = [1, 1]} : vector<16x128xf32> to vector<1x128xf32>
    %61 = tpu.concatenate %59, %60 in 0 : vector<1x128xf32>, vector<1x128xf32> -> vector<2x128xf32>
    %c6 = arith.constant 6 : index
    %c0_32 = arith.constant 0 : index
    %c0_33 = arith.constant 0 : index
    %62 = vector.load %arg4[%c6, %c0_32, %c0_33] : memref<16x128x128xf32, #tpu.memory_space<vmem>>, vector<1x128x128xf32>
    %63 = vector.shape_cast %62 : vector<1x128x128xf32> to vector<128x128xf32>
    %cst_34 = arith.constant dense<0.000000e+00> : vector<2x128xf32>
    %64 = tpu.matmul %61, %63, %cst_34 {dimension_numbers = #tpu.dot_dimension_numbers<[1], [0], [0], [1], [0, 0, 1, 1], [], []>} : vector<2x128xf32>, vector<128x128xf32>, vector<2x128xf32> -> vector<2x128xf32>
    %65 = arith.addf %58, %64 : vector<2x128xf32>
    %66 = vector.extract_strided_slice %8 {offsets = [7, 0], sizes = [1, 128], strides = [1, 1]} : vector<16x128xf32> to vector<1x128xf32>
    %67 = vector.extract_strided_slice %15 {offsets = [7, 0], sizes = [1, 128], strides = [1, 1]} : vector<16x128xf32> to vector<1x128xf32>
    %68 = tpu.concatenate %66, %67 in 0 : vector<1x128xf32>, vector<1x128xf32> -> vector<2x128xf32>
    %c7 = arith.constant 7 : index
    %c0_35 = arith.constant 0 : index
    %c0_36 = arith.constant 0 : index
    %69 = vector.load %arg4[%c7, %c0_35, %c0_36] : memref<16x128x128xf32, #tpu.memory_space<vmem>>, vector<1x128x128xf32>
    %70 = vector.shape_cast %69 : vector<1x128x128xf32> to vector<128x128xf32>
    %cst_37 = arith.constant dense<0.000000e+00> : vector<2x128xf32>
    %71 = tpu.matmul %68, %70, %cst_37 {dimension_numbers = #tpu.dot_dimension_numbers<[1], [0], [0], [1], [0, 0, 1, 1], [], []>} : vector<2x128xf32>, vector<128x128xf32>, vector<2x128xf32> -> vector<2x128xf32>
    %72 = arith.addf %65, %71 : vector<2x128xf32>
    %73 = vector.extract_strided_slice %8 {offsets = [8, 0], sizes = [1, 128], strides = [1, 1]} : vector<16x128xf32> to vector<1x128xf32>
    %74 = vector.extract_strided_slice %15 {offsets = [8, 0], sizes = [1, 128], strides = [1, 1]} : vector<16x128xf32> to vector<1x128xf32>
    %75 = tpu.concatenate %73, %74 in 0 : vector<1x128xf32>, vector<1x128xf32> -> vector<2x128xf32>
    %c8 = arith.constant 8 : index
    %c0_38 = arith.constant 0 : index
    %c0_39 = arith.constant 0 : index
    %76 = vector.load %arg4[%c8, %c0_38, %c0_39] : memref<16x128x128xf32, #tpu.memory_space<vmem>>, vector<1x128x128xf32>
    %77 = vector.shape_cast %76 : vector<1x128x128xf32> to vector<128x128xf32>
    %cst_40 = arith.constant dense<0.000000e+00> : vector<2x128xf32>
    %78 = tpu.matmul %75, %77, %cst_40 {dimension_numbers = #tpu.dot_dimension_numbers<[1], [0], [0], [1], [0, 0, 1, 1], [], []>} : vector<2x128xf32>, vector<128x128xf32>, vector<2x128xf32> -> vector<2x128xf32>
    %79 = arith.addf %72, %78 : vector<2x128xf32>
    %80 = vector.extract_strided_slice %8 {offsets = [9, 0], sizes = [1, 128], strides = [1, 1]} : vector<16x128xf32> to vector<1x128xf32>
    %81 = vector.extract_strided_slice %15 {offsets = [9, 0], sizes = [1, 128], strides = [1, 1]} : vector<16x128xf32> to vector<1x128xf32>
    %82 = tpu.concatenate %80, %81 in 0 : vector<1x128xf32>, vector<1x128xf32> -> vector<2x128xf32>
    %c9 = arith.constant 9 : index
    %c0_41 = arith.constant 0 : index
    %c0_42 = arith.constant 0 : index
    %83 = vector.load %arg4[%c9, %c0_41, %c0_42] : memref<16x128x128xf32, #tpu.memory_space<vmem>>, vector<1x128x128xf32>
    %84 = vector.shape_cast %83 : vector<1x128x128xf32> to vector<128x128xf32>
    %cst_43 = arith.constant dense<0.000000e+00> : vector<2x128xf32>
    %85 = tpu.matmul %82, %84, %cst_43 {dimension_numbers = #tpu.dot_dimension_numbers<[1], [0], [0], [1], [0, 0, 1, 1], [], []>} : vector<2x128xf32>, vector<128x128xf32>, vector<2x128xf32> -> vector<2x128xf32>
    %86 = arith.addf %79, %85 : vector<2x128xf32>
    %87 = vector.extract_strided_slice %8 {offsets = [10, 0], sizes = [1, 128], strides = [1, 1]} : vector<16x128xf32> to vector<1x128xf32>
    %88 = vector.extract_strided_slice %15 {offsets = [10, 0], sizes = [1, 128], strides = [1, 1]} : vector<16x128xf32> to vector<1x128xf32>
    %89 = tpu.concatenate %87, %88 in 0 : vector<1x128xf32>, vector<1x128xf32> -> vector<2x128xf32>
    %c10 = arith.constant 10 : index
    %c0_44 = arith.constant 0 : index
    %c0_45 = arith.constant 0 : index
    %90 = vector.load %arg4[%c10, %c0_44, %c0_45] : memref<16x128x128xf32, #tpu.memory_space<vmem>>, vector<1x128x128xf32>
    %91 = vector.shape_cast %90 : vector<1x128x128xf32> to vector<128x128xf32>
    %cst_46 = arith.constant dense<0.000000e+00> : vector<2x128xf32>
    %92 = tpu.matmul %89, %91, %cst_46 {dimension_numbers = #tpu.dot_dimension_numbers<[1], [0], [0], [1], [0, 0, 1, 1], [], []>} : vector<2x128xf32>, vector<128x128xf32>, vector<2x128xf32> -> vector<2x128xf32>
    %93 = arith.addf %86, %92 : vector<2x128xf32>
    %94 = vector.extract_strided_slice %8 {offsets = [11, 0], sizes = [1, 128], strides = [1, 1]} : vector<16x128xf32> to vector<1x128xf32>
    %95 = vector.extract_strided_slice %15 {offsets = [11, 0], sizes = [1, 128], strides = [1, 1]} : vector<16x128xf32> to vector<1x128xf32>
    %96 = tpu.concatenate %94, %95 in 0 : vector<1x128xf32>, vector<1x128xf32> -> vector<2x128xf32>
    %c11 = arith.constant 11 : index
    %c0_47 = arith.constant 0 : index
    %c0_48 = arith.constant 0 : index
    %97 = vector.load %arg4[%c11, %c0_47, %c0_48] : memref<16x128x128xf32, #tpu.memory_space<vmem>>, vector<1x128x128xf32>
    %98 = vector.shape_cast %97 : vector<1x128x128xf32> to vector<128x128xf32>
    %cst_49 = arith.constant dense<0.000000e+00> : vector<2x128xf32>
    %99 = tpu.matmul %96, %98, %cst_49 {dimension_numbers = #tpu.dot_dimension_numbers<[1], [0], [0], [1], [0, 0, 1, 1], [], []>} : vector<2x128xf32>, vector<128x128xf32>, vector<2x128xf32> -> vector<2x128xf32>
    %100 = arith.addf %93, %99 : vector<2x128xf32>
    %101 = vector.extract_strided_slice %8 {offsets = [12, 0], sizes = [1, 128], strides = [1, 1]} : vector<16x128xf32> to vector<1x128xf32>
    %102 = vector.extract_strided_slice %15 {offsets = [12, 0], sizes = [1, 128], strides = [1, 1]} : vector<16x128xf32> to vector<1x128xf32>
    %103 = tpu.concatenate %101, %102 in 0 : vector<1x128xf32>, vector<1x128xf32> -> vector<2x128xf32>
    %c12 = arith.constant 12 : index
    %c0_50 = arith.constant 0 : index
    %c0_51 = arith.constant 0 : index
    %104 = vector.load %arg4[%c12, %c0_50, %c0_51] : memref<16x128x128xf32, #tpu.memory_space<vmem>>, vector<1x128x128xf32>
    %105 = vector.shape_cast %104 : vector<1x128x128xf32> to vector<128x128xf32>
    %cst_52 = arith.constant dense<0.000000e+00> : vector<2x128xf32>
    %106 = tpu.matmul %103, %105, %cst_52 {dimension_numbers = #tpu.dot_dimension_numbers<[1], [0], [0], [1], [0, 0, 1, 1], [], []>} : vector<2x128xf32>, vector<128x128xf32>, vector<2x128xf32> -> vector<2x128xf32>
    %107 = arith.addf %100, %106 : vector<2x128xf32>
    %108 = vector.extract_strided_slice %8 {offsets = [13, 0], sizes = [1, 128], strides = [1, 1]} : vector<16x128xf32> to vector<1x128xf32>
    %109 = vector.extract_strided_slice %15 {offsets = [13, 0], sizes = [1, 128], strides = [1, 1]} : vector<16x128xf32> to vector<1x128xf32>
    %110 = tpu.concatenate %108, %109 in 0 : vector<1x128xf32>, vector<1x128xf32> -> vector<2x128xf32>
    %c13 = arith.constant 13 : index
    %c0_53 = arith.constant 0 : index
    %c0_54 = arith.constant 0 : index
    %111 = vector.load %arg4[%c13, %c0_53, %c0_54] : memref<16x128x128xf32, #tpu.memory_space<vmem>>, vector<1x128x128xf32>
    %112 = vector.shape_cast %111 : vector<1x128x128xf32> to vector<128x128xf32>
    %cst_55 = arith.constant dense<0.000000e+00> : vector<2x128xf32>
    %113 = tpu.matmul %110, %112, %cst_55 {dimension_numbers = #tpu.dot_dimension_numbers<[1], [0], [0], [1], [0, 0, 1, 1], [], []>} : vector<2x128xf32>, vector<128x128xf32>, vector<2x128xf32> -> vector<2x128xf32>
    %114 = arith.addf %107, %113 : vector<2x128xf32>
    %115 = vector.extract_strided_slice %8 {offsets = [14, 0], sizes = [1, 128], strides = [1, 1]} : vector<16x128xf32> to vector<1x128xf32>
    %116 = vector.extract_strided_slice %15 {offsets = [14, 0], sizes = [1, 128], strides = [1, 1]} : vector<16x128xf32> to vector<1x128xf32>
    %117 = tpu.concatenate %115, %116 in 0 : vector<1x128xf32>, vector<1x128xf32> -> vector<2x128xf32>
    %c14 = arith.constant 14 : index
    %c0_56 = arith.constant 0 : index
    %c0_57 = arith.constant 0 : index
    %118 = vector.load %arg4[%c14, %c0_56, %c0_57] : memref<16x128x128xf32, #tpu.memory_space<vmem>>, vector<1x128x128xf32>
    %119 = vector.shape_cast %118 : vector<1x128x128xf32> to vector<128x128xf32>
    %cst_58 = arith.constant dense<0.000000e+00> : vector<2x128xf32>
    %120 = tpu.matmul %117, %119, %cst_58 {dimension_numbers = #tpu.dot_dimension_numbers<[1], [0], [0], [1], [0, 0, 1, 1], [], []>} : vector<2x128xf32>, vector<128x128xf32>, vector<2x128xf32> -> vector<2x128xf32>
    %121 = arith.addf %114, %120 : vector<2x128xf32>
    %122 = vector.extract_strided_slice %8 {offsets = [15, 0], sizes = [1, 128], strides = [1, 1]} : vector<16x128xf32> to vector<1x128xf32>
    %123 = vector.extract_strided_slice %15 {offsets = [15, 0], sizes = [1, 128], strides = [1, 1]} : vector<16x128xf32> to vector<1x128xf32>
    %124 = tpu.concatenate %122, %123 in 0 : vector<1x128xf32>, vector<1x128xf32> -> vector<2x128xf32>
    %c15 = arith.constant 15 : index
    %c0_59 = arith.constant 0 : index
    %c0_60 = arith.constant 0 : index
    %125 = vector.load %arg4[%c15, %c0_59, %c0_60] : memref<16x128x128xf32, #tpu.memory_space<vmem>>, vector<1x128x128xf32>
    %126 = vector.shape_cast %125 : vector<1x128x128xf32> to vector<128x128xf32>
    %cst_61 = arith.constant dense<0.000000e+00> : vector<2x128xf32>
    %127 = tpu.matmul %124, %126, %cst_61 {dimension_numbers = #tpu.dot_dimension_numbers<[1], [0], [0], [1], [0, 0, 1, 1], [], []>} : vector<2x128xf32>, vector<128x128xf32>, vector<2x128xf32> -> vector<2x128xf32>
    %128 = arith.addf %121, %127 : vector<2x128xf32>
    %c0_62 = arith.constant 0 : index
    %c0_63 = arith.constant 0 : index
    %129 = vector.load %arg5[%c0_62, %c0_63] : memref<1x128xf32, #tpu.memory_space<vmem>>, vector<1x128xf32>
    %130 = vector.broadcast %129 : vector<1x128xf32> to vector<2x128xf32>
    %131 = arith.addf %128, %130 : vector<2x128xf32>
    %132 = math.tanh %131 : vector<2x128xf32>
    %c0_64 = arith.constant 0 : index
    %c0_65 = arith.constant 0 : index
    %133 = vector.load %arg6[%c0_64, %c0_65] : memref<2x128xf32, #tpu.memory_space<vmem>>, vector<2x128xf32>
    tpu.vector_store %arg6[%c0_64, %c0_65], %132 {strides = array<i32>} : memref<2x128xf32, #tpu.memory_space<vmem>>, vector<2x128xf32>,
    return
  }
  func.func @transform_0(%arg0: i32) -> (i32, i32, i32) {
    %c0_i32 = arith.constant 0 : i32
    %c0_i32_0 = arith.constant 0 : i32
    %c0_i32_1 = arith.constant 0 : i32
    return %arg0, %c0_i32, %c0_i32_0 : i32, i32, i32
  }
  func.func @transform_1(%arg0: i32) -> (i32, i32) {
    %c0_i32 = arith.constant 0 : i32
    %c0_i32_0 = arith.constant 0 : i32
    %c0_i32_1 = arith.constant 0 : i32
    return %c0_i32, %c0_i32_0 : i32, i32
  }
  func.func @transform_2(%arg0: i32) -> (i32, i32) {
    %c0_i32 = arith.constant 0 : i32
    %c0_i32_0 = arith.constant 0 : i32
    %c0_i32_1 = arith.constant 0 : i32
    return %c0_i32, %c0_i32_0 : i32, i32
  }
  func.func @transform_3(%arg0: i32) -> (i32, i32, i32) {
    %c0_i32 = arith.constant 0 : i32
    %c0_i32_0 = arith.constant 0 : i32
    %c0_i32_1 = arith.constant 0 : i32
    %c0_i32_2 = arith.constant 0 : i32
    return %c0_i32, %c0_i32_0, %c0_i32_1 : i32, i32, i32
  }
  func.func @transform_4(%arg0: i32) -> (i32, i32) {
    %c0_i32 = arith.constant 0 : i32
    %c0_i32_0 = arith.constant 0 : i32
    %c0_i32_1 = arith.constant 0 : i32
    return %c0_i32, %c0_i32_0 : i32, i32
  }
  func.func @transform_5(%arg0: i32) -> (i32, i32) {
    %c0_i32 = arith.constant 0 : i32
    %c0_i32_0 = arith.constant 0 : i32
    return %arg0, %c0_i32 : i32, i32
  }
}

</mosaic_0001>

<bundles_post_ra>
// kernel: _forward_impl.1
= control target key start
LH: loop header
LB: loop body
LE: loop exit
PB: predicated region body
PF: predicated region fallthrough
CT: control target
= control target key end

     0   :  { %v3293_v7 = vmov 0   ;;  %vm42_vm0 = vcmask 457728   ;;  %s4407_s0 = inlined_call_operand.vmem [shape: f32[2,56,128], index: 0, kind: input, shape index: {}]   ;;  %s4408_s1 = inlined_call_operand.vmem [shape: f32[16,56], index: 1, kind: input, shape index: {}]   ;;  %s4409_s2 = inlined_call_operand.vmem [shape: f32[16,1], index: 2, kind: input, shape index: {}]   ;;  %s4410_s3 = inlined_call_operand.vmem [shape: f32[16,128,128], index: 3, kind: input, shape index: {}]   ;;  %s4411_s4 = inlined_call_operand.vmem [shape: f32[1,128], index: 4, kind: input, shape index: {}]   ;;  %s4412_s5 = inlined_call_operand.hbm [shape: f32[2,128], index: 5, kind: output, shape index: {}]  }
   0x1   :  { %v25_v0 = vld [vmem:[%s4407_s0] sm:$0xff]  ;;  %v26_v1 = vld [vmem:[%s4407_s0 + $0x8] sm:$0xff]  ;;  %v1719_v2 = vld [vmem:[%s4407_s0 + $0x38] sm:$0xff]  ;;  %3266 = vset.pattern.permute.xlu0 %v3293_v7 }
   0x2   :  { %v2853_v3 = vpack.c.bf16 %v26_v1, %v25_v0  ;;  %v1720_v4 = vld [vmem:[%s4407_s0 + $0x40] sm:$0xff]  ;;  %v27_v5 = vld [vmem:[%s4407_s0 + $0x10] sm:$0xff]  ;;  %v28_v6 = vld [vmem:[%s4407_s0 + $0x18] sm:$0xff] }
   0x3   :  { %v2865_v8 = vpack.c.bf16 %v1720_v4, %v1719_v2  ;;  %v2857_v9 = vpack.c.bf16 %v28_v6, %v27_v5  ;;  %v1721_v10 = vld [vmem:[%s4407_s0 + $0x48] sm:$0xff]  ;;  %v1722_v11 = vld [vmem:[%s4407_s0 + $0x50] sm:$0xff]  ;;  %v29_v12 = vld [vmem:[%s4407_s0 + $0x20] sm:$0xff] }
   0x4   :  { %2854 = vmatprep.subr.bf16.mxu0 %v2853_v3  ;;  %v2869_v13 = vpack.c.bf16 %v1722_v11, %v1721_v10  ;;  %v30_v14 = vld [vmem:[%s4407_s0 + $0x28] sm:$0xff]  ;;  %v1723_v15 = vld [vmem:[%s4407_s0 + $0x58] sm:$0xff]  ;;  %v1724_v16 = vld [vmem:[%s4407_s0 + $0x60] sm:$0xff] }
   0x5   :  { %2866 = vmatprep.subr.bf16.mxu1 %v2865_v8  ;;  %2856 = vmatpush3.bf16.msra.mxu0 %v2853_v3  ;;  %v21_v17 = vld [vmem:[%s4408_s1] sm:$0xff]  ;;  %v2861_v18 = vpack.c.bf16 %v30_v14, %v29_v12  ;;  %v2873_v20 = vpack.c.bf16 %v1724_v16, %v1723_v15  ;;  %v24_v21 = vld [vmem:[%s4409_s2 + $0x8] sm:$0xff]  ;;  %v31_v22 = vld [vmem:[%s4407_s0 + $0x30] sm:$0xff] }
   0x6   :  { %2868 = vmatpush3.bf16.msra.mxu1 %v2865_v8  ;;  %2858 = vmatprep.subr.bf16.mxu0 %v2857_v9  ;;  %v23_v19 = vld [vmem:[%s4409_s2] sm:$0xff]  ;;  %v1725_v23 = vld [vmem:[%s4407_s0 + $0x68] sm:$0xff] }
   0x7   :  { %2870 = vmatprep.subr.bf16.mxu1 %v2869_v13  ;;  %2273 = vmatprep.mubr.msk.f32.mxu0 %vm42_vm0, %v21_v17  ;;  %v1728_v24 = vld [vmem:[%s4410_s3 + $0x80] sm:$0xff]  ;;  %v1729_v25 = vld [vmem:[%s4410_s3 + $0x88] sm:$0xff] }
   0x8   :  { %2290 = vmatprep.mubr.msk.f32.mxu1 %vm42_vm0, %v21_v17  ;;  %34 = vperm.xlu0 %3266, %v23_v19   ;;  %v216_v26 = vld [vmem:[%s4410_s3] sm:$0xff]  ;;  %v217_v27 = vld [vmem:[%s4410_s3 + $0x8] sm:$0xff] }
   0x9   :  { %2860 = vmatpush3.bf16.msra.mxu0 %v2857_v9  ;;  %v22_v28 = vld [vmem:[%s4408_s1 + $0x8] sm:$0xff] }
   0xa   :  { %2872 = vmatpush3.bf16.msra.mxu1 %v2869_v13  ;;  %2862 = vmatprep.subr.bf16.mxu0 %v2861_v18 }
   0xb   :  { %2874 = vmatprep.subr.bf16.mxu1 %v2873_v20 }
   0xc   :  { %39 = vperm.xlu0 %3266, %v24_v21  }
   0xd   :  { %2864 = vmatpush3.bf16.msra.mxu0 %v2861_v18 }
   0xe   :  { %2876 = vmatpush3.bf16.msra.mxu1 %v2873_v20  ;;  %2271 = vmatprep.subr.mxu0 %v31_v22 }
   0xf   :  { %2288 = vmatprep.subr.mxu1 %v1725_v23 }
  0x10   :  { %10 = vsyncpa [#allocation3], 0  ;;  %v2878_v29 = vpack.c.bf16 %v1729_v25, %v1728_v24  ;;  %v2902_v30 = vpack.c.bf16 %v217_v27, %v216_v26  ;;  %v1730_v31 = vld [vmem:[%s4410_s3 + $0x90] sm:$0xff]  ;;  %v1731_v32 = vld [vmem:[%s4410_s3 + $0x98] sm:$0xff]  ;;  %v3294_v35 = vmov 0.0|0.0   ;;  %vm3295_vm1 = vmmov 0  }
  0x11   :  { %2272 = vmatpush3.msra.mxu0 %v31_v22  ;;  %v218_v33 = vld [vmem:[%s4410_s3 + $0x10] sm:$0xff]  ;;  %v219_v34 = vld [vmem:[%s4410_s3 + $0x18] sm:$0xff]  ;;  %v2881_v36 = vpack.c.bf16 %v1731_v32, %v1730_v31  ;;  %v1732_v38 = vld [vmem:[%s4410_s3 + $0xa0] sm:$0xff]  ;;  %v3296_v10 = vmov 0.0   ;;  %vm214_vm2 = vcmask 1040384   ;;  %s3297_s11 = smov [#allocation2]  }
  0x12   :  { %2289 = vmatpush3.msra.mxu1 %v1725_v23  ;;  %2274 = vmatmul.mubr.msk.f32.vlgmr.msra.gmra.mrb[0].mxu0 %vm42_vm0, %v22_v28  ;;  %v2905_v37 = vpack.c.bf16 %v219_v34, %v218_v33  ;;  %v1733_v39 = vld [vmem:[%s4410_s3 + $0xa8] sm:$0xff]  ;;  %v220_v40 = vld [vmem:[%s4410_s3 + $0x20] sm:$0xff]  ;;  %v1734_v44 = vld [vmem:[%s4410_s3 + $0xb0] sm:$0xff]  ;;  %s1709_s12 = sshll.u32 %s3297_s11, 4  ;;  %s1710_s12 = int_to_ptr.vmem [resolvable:$true] %s1709_s12 }
  0x13   :  { %2291 = vmatmul.mubr.msk.f32.vlgmr.msra.gmra.mrb[0].mxu1 %vm42_vm0, %v22_v28  ;;  %2877 = vmatprep.subr.bf16.mxu0 %v3294_v35  ;;  %v221_v41 = vld [vmem:[%s4410_s3 + $0x28] sm:$0xff]  ;;  %v2884_v42 = vpack.c.bf16 %v1733_v39, %v1732_v38  ;;  %v1735_v45 = vld [vmem:[%s4410_s3 + $0xb8] sm:$0xff]  ;;  %v222_v46 = vld [vmem:[%s4410_s3 + $0x30] sm:$0xff]  ;;  %s3269_s13 = scalar_lea.vmem %s1710_s12, 32  ;;  %p3274_p1 = scmp.lt.s32.totalorder %s1710_s12, %s1710_s12 }
  0x14   :  { %2901 = vmatprep.subr.bf16.mxu1 %v3294_v35  ;;  %2879 = vmatpush3.bf16.msra.mxu0 %v2878_v29  ;;  %v2908_v43 = vpack.c.bf16 %v221_v41, %v220_v40  ;;  %v223_v47 = vld [vmem:[%s4410_s3 + $0x38] sm:$0xff]  ;;  %v2887_v48 = vpack.c.bf16 %v1735_v45, %v1734_v44  ;;  %v1736_v50 = vld [vmem:[%s4410_s3 + $0xc0] sm:$0xff]  ;;  %v1737_v51 = vld [vmem:[%s4410_s3 + $0xc8] sm:$0xff]  ;;  %p3270_p0 = scmp.ne.s32.totalorder %s1710_s12, %s3269_s13  ;;  %p3275_p2 = scmp.lt.s32.totalorder %s3269_s13, %s3269_s13 }
  0x15   :  { %2903 = vmatpush3.bf16.msra.mxu1 %v2902_v30  ;;  %2880 = vmatprep.subr.bf16.mxu0 %v3294_v35  ;;  %v2911_v49 = vpack.c.bf16 %v223_v47, %v222_v46  ;;  %v224_v52 = vld [vmem:[%s4410_s3 + $0x40] sm:$0xff]  ;;  %v225_v53 = vld [vmem:[%s4410_s3 + $0x48] sm:$0xff]  ;;  %v2890_v54 = vpack.c.bf16 %v1737_v51, %v1736_v50  ;;  %v1738_v56 = vld [vmem:[%s4410_s3 + $0xd0] sm:$0xff] }
  0x16   :  { %2904 = vmatprep.subr.bf16.mxu1 %v3294_v35  ;;  %v2914_v55 = vpack.c.bf16 %v225_v53, %v224_v52  ;;  %v1739_v57 = vld [vmem:[%s4410_s3 + $0xd8] sm:$0xff]  ;;  %v226_v58 = vld [vmem:[%s4410_s3 + $0x50] sm:$0xff]  ;;  %v1740_v62 = vld [vmem:[%s4410_s3 + $0xe0] sm:$0xff]  ;;  %2325 = vmatprep.mubr.msk.f32.mxu0 %vm3295_vm1, %v3296_v10  ;;  %p3276_p3 = por %p3275_p2, %p3274_p1 }
  0x17   :  { %v227_v59 = vld [vmem:[%s4410_s3 + $0x58] sm:$0xff]  ;;  %v2893_v60 = vpack.c.bf16 %v1739_v57, %v1738_v56  ;;  %v1741_v63 = vld [vmem:[%s4410_s3 + $0xe8] sm:$0xff]  ;;  %v228_v0 = vld [vmem:[%s4410_s3 + $0x60] sm:$0xff]  ;;  %2360 = vmatprep.mubr.msk.f32.mxu1 %vm3295_vm1, %v3296_v10 }
  0x18   :  { %2882 = vmatpush3.bf16.msra.mxu0 %v2881_v36  ;;  %v2917_v61 = vpack.c.bf16 %v227_v59, %v226_v58  ;;  %v2896_v1 = vpack.c.bf16 %v1741_v63, %v1740_v62  ;;  %v229_v2 = vld [vmem:[%s4410_s3 + $0x68] sm:$0xff]  ;;  %v1742_v4 = vld [vmem:[%s4410_s3 + $0xf0] sm:$0xff]  ;;  %v1743_v5 = vld [vmem:[%s4410_s3 + $0xf8] sm:$0xff]  ;;  %p3277_p4 = pnand %p3276_p3, %p3270_p0 }
  0x19   :  { %2906 = vmatpush3.bf16.msra.mxu1 %v2905_v37  ;;  %2883 = vmatprep.subr.bf16.mxu0 %v3294_v35  ;;  %v2920_v3 = vpack.c.bf16 %v229_v2, %v228_v0  ;;  %v230_v6 = vld [vmem:[%s4410_s3 + $0x70] sm:$0xff]  ;;  %v2899_v7 = vpack.c.bf16 %v1743_v5, %v1742_v4  ;;  %v231_v8 = vld [vmem:[%s4410_s3 + $0x78] sm:$0xff]  ;;  %v1744_v14 = vld [vmem:[%s4410_s3 + $0x100] sm:$0xff] }
  0x1a   :  { %2907 = vmatprep.subr.bf16.mxu1 %v3294_v35  ;;  %v2923_v9 = vpack.c.bf16 %v231_v8, %v230_v6  ;;  %v1745_v15 = vld [vmem:[%s4410_s3 + $0x108] sm:$0xff]  ;;  %v1760_v16 = vld [vmem:[%s4410_s3 + $0x180] sm:$0xff]  ;;  %v1746_v21 = vld [vmem:[%s4410_s3 + $0x110] sm:$0xff] }
  0x1b   :  { %v1761_v20 = vld [vmem:[%s4410_s3 + $0x188] sm:$0xff]  ;;  %v1747_v22 = vld [vmem:[%s4410_s3 + $0x118] sm:$0xff]  ;;  %v2926_v29 = vpack.c.bf16 %v1745_v15, %v1744_v14  ;;  %v1762_v46 = vld [vmem:[%s4410_s3 + $0x190] sm:$0xff] }
  0x1c   :  { %2885 = vmatpush3.bf16.msra.mxu0 %v2884_v42  ;;  %v2950_v30 = vpack.c.bf16 %v1761_v20, %v1760_v16  ;;  %v2929_v31 = vpack.c.bf16 %v1747_v22, %v1746_v21  ;;  %v1763_v47 = vld [vmem:[%s4410_s3 + $0x198] sm:$0xff]  ;;  %v1749_v56 = vld [vmem:[%s4410_s3 + $0x128] sm:$0xff]  ;;  %v1764_v0 = vld [vmem:[%s4410_s3 + $0x1a0] sm:$0xff] }
  0x1d   :  { %2909 = vmatpush3.bf16.msra.mxu1 %v2908_v43  ;;  %2886 = vmatprep.subr.bf16.mxu0 %v3294_v35  ;;  %v1750_v15 = vld [vmem:[%s4410_s3 + $0x130] sm:$0xff]  ;;  %v1751_v16 = vld [vmem:[%s4410_s3 + $0x138] sm:$0xff] }
  0x1e   :  { %2910 = vmatprep.subr.bf16.mxu1 %v3294_v35  ;;  %v1766_v20 = vld [vmem:[%s4410_s3 + $0x1b0] sm:$0xff]  ;;  %v1767_v21 = vld [vmem:[%s4410_s3 + $0x1b8] sm:$0xff] }
  0x20   :  { %2888 = vmatpush3.bf16.msra.mxu0 %v2887_v48 }
  0x21   :  { %2912 = vmatpush3.bf16.msra.mxu1 %v2911_v49  ;;  %2889 = vmatprep.subr.bf16.mxu0 %v3294_v35 }
  0x22   :  { %2913 = vmatprep.subr.bf16.mxu1 %v3294_v35 }
  0x24   :  { %2891 = vmatpush3.bf16.msra.mxu0 %v2890_v54 }
  0x25   :  { %2915 = vmatpush3.bf16.msra.mxu1 %v2914_v55  ;;  %2892 = vmatprep.subr.bf16.mxu0 %v3294_v35  ;;  %v1748_v55 = vld [vmem:[%s4410_s3 + $0x120] sm:$0xff] }
  0x26   :  { %2916 = vmatprep.subr.bf16.mxu1 %v3294_v35  ;;  %v2932_v5 = vpack.c.bf16 %v1749_v56, %v1748_v55  ;;  %v1774_v55 = vld [vmem:[%s4410_s3 + $0x1f0] sm:$0xff]  ;;  %v1775_v56 = vld [vmem:[%s4410_s3 + $0x1f8] sm:$0xff] }
  0x28   :  { %2894 = vmatpush3.bf16.msra.mxu0 %v2893_v60 }
  0x29   :  { %2918 = vmatpush3.bf16.msra.mxu1 %v2917_v61  ;;  %2895 = vmatprep.subr.bf16.mxu0 %v3294_v35  ;;  %v2953_v61 = vpack.c.bf16 %v1763_v47, %v1762_v46  ;;  %v1772_v46 = vld [vmem:[%s4410_s3 + $0x1e0] sm:$0xff]  ;;  %v1773_v47 = vld [vmem:[%s4410_s3 + $0x1e8] sm:$0xff] }
  0x2a   :  { %2919 = vmatprep.subr.bf16.mxu1 %v3294_v35 }
  0x2c   :  { %2897 = vmatpush3.bf16.msra.mxu0 %v2896_v1  ;;  %v1765_v1 = vld [vmem:[%s4410_s3 + $0x1a8] sm:$0xff] }
  0x2d   :  { %2921 = vmatpush3.bf16.msra.mxu1 %v2920_v3  ;;  %2898 = vmatprep.subr.bf16.mxu0 %v3294_v35  ;;  %v2956_v14 = vpack.c.bf16 %v1765_v1, %v1764_v0  ;;  %v1793_v0 = vld [vmem:[%s4410_s3 + $0x288] sm:$0xff] }
  0x2e   :  { %2922 = vmatprep.subr.bf16.mxu1 %v3294_v35 }
  0x30   :  { %2900 = vmatpush3.bf16.msra.mxu0 %v2899_v7 }
  0x31   :  { %2924 = vmatpush3.bf16.msra.mxu1 %v2923_v9  ;;  %2925 = vmatprep.subr.bf16.mxu0 %v3294_v35 }
  0x32   :  { %2949 = vmatprep.subr.bf16.mxu1 %v3294_v35 }
  0x87   :  { %v35_v11 = vpop.permute.xlu0 %34 }
  0x8b   :  { %v40_v12 = vpop.permute.xlu0 %39 }
  0xe5   :  { %v2275_v13 = vpop.f32.mrb[0].mxu0 }
  0xe6   :  { %v121_v17 = vadd.f32 %v2275_v13, %v40_v12  ;;  %v2292_v18 = vpop.f32.mrb[0].mxu1  ;;  %v115_v19 = vpop.f32.mrb[1].mxu0 }
  0xe7   :  { %v206_v23 = vadd.f32 %v2292_v18, %v40_v12  ;;  %v116_v24 = vadd.f32 %v115_v19, %v35_v11  ;;  %v200_v25 = vpop.f32.mrb[1].mxu1 }
  0xe8   :  { %v3522_v26 = vmax.f32 %v121_v17, 0.0  ;;  %v201_v27 = vadd.f32 %v200_v25, %v35_v11 }
  0xe9   :  { %v124_v28 = vmax.f32 %v116_v24, 0.0  ;;  %v3524_v32 = vmax.f32 %v206_v23, 0.0 }
  0xea   :  { %v209_v33 = vmax.f32 %v201_v27, 0.0  ;;  %v1044_v34 = vrot.slane %v3522_v26, 1  ;;  %v1135_v36 = vrot.slane %v3522_v26, 2  ;;  %v1228_v7 = vrot.slane %v3522_v26, 3 }
  0xeb   :  { %v233_v37 = vrot.slane %v124_v28, 1  ;;  %v393_v38 = vrot.slane %v124_v28, 2  ;;  %v486_v39 = vrot.slane %v124_v28, 3  ;;  %v579_v40 = vrot.slane %v124_v28, 4 }
  0xec   :  { %v212_v41 = vrot.slane %v209_v33, 7  ;;  %v395_v42 = vrot.slane %v209_v33, 1  ;;  %v488_v43 = vrot.slane %v209_v33, 2  ;;  %v581_v44 = vrot.slane %v209_v33, 3 }
  0xed   :  { %v235_v45 = vsel %vm214_vm2, %v233_v37, %v209_v33  ;;  %v672_v48 = vrot.slane %v124_v28, 5  ;;  %v674_v49 = vrot.slane %v209_v33, 4  ;;  %v765_v50 = vrot.slane %v124_v28, 6 }
  0xee   :  { %2326 = vmatmul.mubr.f32.vlgmr.msra.gmra.mrb[2].mxu0 %v235_v45  ;;  %v215_v51 = vsel %vm214_vm2, %v124_v28, %v212_v41  ;;  %v3537_v52 = vsel %vm214_vm2, %v393_v38, %v395_v42  ;;  %v3540_v53 = vsel %vm214_vm2, %v486_v39, %v488_v43  ;;  %v3543_v54 = vsel %vm214_vm2, %v579_v40, %v581_v44  ;;  %v1754_v38 = vld [vmem:[%s4410_s3 + $0x150] sm:$0xff]  ;;  %v1755_v39 = vld [vmem:[%s4410_s3 + $0x158] sm:$0xff]  ;;  %v1756_v44 = vld [vmem:[%s4410_s3 + $0x160] sm:$0xff] }
  0xef   :  { %2361 = vmatmul.mubr.f32.vlgmr.msra.gmra.mrb[2].mxu1 %v215_v51  ;;  %2927 = vmatpush3.bf16.msra.mxu0 %v2926_v29  ;;  %v3552_v57 = vsel %vm214_vm2, %v672_v48, %v674_v49  ;;  %v767_v58 = vrot.slane %v209_v33, 5  ;;  %v858_v59 = vrot.slane %v124_v28, 7  ;;  %v860_v60 = vrot.slane %v209_v33, 6  ;;  %v1768_v33 = vld [vmem:[%s4410_s3 + $0x1c0] sm:$0xff]  ;;  %v1770_v40 = vld [vmem:[%s4410_s3 + $0x1d0] sm:$0xff]  ;;  %v1771_v41 = vld [vmem:[%s4410_s3 + $0x1d8] sm:$0xff] }
  0xf0   :  { %2951 = vmatpush3.bf16.msra.mxu1 %v2950_v30  ;;  %2928 = vmatprep.subr.bf16.mxu0 %v3294_v35  ;;  %v952_v62 = vrot.slane %v3524_v32, 7  ;;  %v3558_v63 = vsel %vm214_vm2, %v1044_v34, %v3524_v32  ;;  %v1137_v4 = vrot.slane %v3524_v32, 1  ;;  %v1230_v8 = vrot.slane %v3524_v32, 2  ;;  %v1769_v34 = vld [vmem:[%s4410_s3 + $0x1c8] sm:$0xff]  ;;  %v1759_v51 = vld [vmem:[%s4410_s3 + $0x178] sm:$0xff] }
  0xf1   :  { %2952 = vmatprep.subr.bf16.mxu1 %v3294_v35  ;;  %2395 = vmatprep.mubr.msk.f32.mxu0 %vm3295_vm1, %v3296_v10  ;;  %v3570_v2 = vsel %vm214_vm2, %v765_v50, %v767_v58  ;;  %v3573_v3 = vsel %vm214_vm2, %v858_v59, %v860_v60  ;;  %v1321_v11 = vrot.slane %v3522_v26, 4  ;;  %v1323_v12 = vrot.slane %v3524_v32, 3  ;;  %v1757_v45 = vld [vmem:[%s4410_s3 + $0x168] sm:$0xff]  ;;  %v1758_v50 = vld [vmem:[%s4410_s3 + $0x170] sm:$0xff]  ;;  %v1776_v60 = vld [vmem:[%s4410_s3 + $0x200] sm:$0xff] }
  0xf2   :  { %2430 = vmatprep.mubr.msk.f32.mxu1 %vm3295_vm1, %v3296_v10  ;;  %v3580_v6 = vsel %vm214_vm2, %v3522_v26, %v952_v62  ;;  %v3585_v9 = vsel %vm214_vm2, %v1135_v36, %v1137_v4  ;;  %v1414_v13 = vrot.slane %v3522_v26, 5  ;;  %v3598_v17 = vsel %vm214_vm2, %v1228_v7, %v1230_v8  ;;  %v1792_v62 = vld [vmem:[%s4410_s3 + $0x280] sm:$0xff]  ;;  %v1779_v7 = vld [vmem:[%s4410_s3 + $0x218] sm:$0xff]  ;;  %v1794_v8 = vld [vmem:[%s4410_s3 + $0x290] sm:$0xff] }
  0xf3   :  { %2930 = vmatpush3.bf16.msra.mxu0 %v2929_v31  ;;  %v1416_v18 = vrot.slane %v3524_v32, 4  ;;  %v1507_v19 = vrot.slane %v3522_v26, 6  ;;  %v3610_v22 = vsel %vm214_vm2, %v1321_v11, %v1323_v12  ;;  %v1509_v23 = vrot.slane %v3524_v32, 5  ;;  %v1795_v11 = vld [vmem:[%s4410_s3 + $0x298] sm:$0xff] }
  0xf4   :  { %2954 = vmatpush3.bf16.msra.mxu1 %v2953_v61  ;;  %2931 = vmatprep.subr.bf16.mxu0 %v3294_v35  ;;  %v1600_v24 = vrot.slane %v3522_v26, 7  ;;  %v1602_v25 = vrot.slane %v3524_v32, 6  ;;  %v2935_v28 = vpack.c.bf16 %v1751_v16, %v1750_v15  ;;  %v2959_v31 = vpack.c.bf16 %v1767_v21, %v1766_v20  ;;  %v1752_v26 = vld [vmem:[%s4410_s3 + $0x140] sm:$0xff]  ;;  %v1753_v32 = vld [vmem:[%s4410_s3 + $0x148] sm:$0xff]  ;;  %v1783_v20 = vld [vmem:[%s4410_s3 + $0x238] sm:$0xff] }
  0xf5   :  { %2955 = vmatprep.subr.bf16.mxu1 %v3294_v35  ;;  %v3616_v27 = vsel %vm214_vm2, %v1414_v13, %v1416_v18  ;;  %v3619_v29 = vsel %vm214_vm2, %v1507_v19, %v1509_v23  ;;  %v2938_v36 = vpack.c.bf16 %v1753_v32, %v1752_v26  ;;  %v2962_v37 = vpack.c.bf16 %v1769_v34, %v1768_v33  ;;  %v1777_v61 = vld [vmem:[%s4410_s3 + $0x208] sm:$0xff]  ;;  %v1782_v19 = vld [vmem:[%s4410_s3 + $0x230] sm:$0xff]  ;;  %v1799_v23 = vld [vmem:[%s4410_s3 + $0x2b8] sm:$0xff] }
  0xf6   :  { %v3622_v30 = vsel %vm214_vm2, %v1600_v24, %v1602_v25  ;;  %v2941_v42 = vpack.c.bf16 %v1755_v39, %v1754_v38  ;;  %v2965_v43 = vpack.c.bf16 %v1771_v41, %v1770_v40  ;;  %v2944_v48 = vpack.c.bf16 %v1757_v45, %v1756_v44  ;;  %v1781_v15 = vld [vmem:[%s4410_s3 + $0x228] sm:$0xff]  ;;  %v1798_v21 = vld [vmem:[%s4410_s3 + $0x2b0] sm:$0xff]  ;;  %v1800_v26 = vld [vmem:[%s4410_s3 + $0x2c0] sm:$0xff] }
  0xf7   :  { %2933 = vmatpush3.bf16.msra.mxu0 %v2932_v5  ;;  %v2968_v49 = vpack.c.bf16 %v1773_v47, %v1772_v46  ;;  %v2947_v58 = vpack.c.bf16 %v1759_v51, %v1758_v50  ;;  %v2971_v59 = vpack.c.bf16 %v1775_v56, %v1774_v55  ;;  %v2974_v1 = vpack.c.bf16 %v1777_v61, %v1776_v60  ;;  %v1778_v5 = vld [vmem:[%s4410_s3 + $0x210] sm:$0xff]  ;;  %v1801_v32 = vld [vmem:[%s4410_s3 + $0x2c8] sm:$0xff]  ;;  %v1803_v39 = vld [vmem:[%s4410_s3 + $0x2d8] sm:$0xff] }
  0xf8   :  { %2957 = vmatpush3.bf16.msra.mxu1 %v2956_v14  ;;  %2934 = vmatprep.subr.bf16.mxu0 %v3294_v35  ;;  %v2998_v4 = vpack.c.bf16 %v1793_v0, %v1792_v62  ;;  %v2977_v12 = vpack.c.bf16 %v1779_v7, %v1778_v5  ;;  %v3001_v13 = vpack.c.bf16 %v1795_v11, %v1794_v8  ;;  %v1780_v14 = vld [vmem:[%s4410_s3 + $0x220] sm:$0xff]  ;;  %v1802_v38 = vld [vmem:[%s4410_s3 + $0x2d0] sm:$0xff]  ;;  %v1805_v45 = vld [vmem:[%s4410_s3 + $0x2e8] sm:$0xff] }
  0xf9   :  { %2958 = vmatprep.subr.bf16.mxu1 %v3294_v35  ;;  %v2980_v16 = vpack.c.bf16 %v1781_v15, %v1780_v14  ;;  %v2983_v24 = vpack.c.bf16 %v1783_v20, %v1782_v19  ;;  %v3007_v25 = vpack.c.bf16 %v1799_v23, %v1798_v21  ;;  %v3010_v34 = vpack.c.bf16 %v1801_v32, %v1800_v26  ;;  %v1804_v44 = vld [vmem:[%s4410_s3 + $0x2e0] sm:$0xff]  ;;  %v1806_v50 = vld [vmem:[%s4410_s3 + $0x2f0] sm:$0xff]  ;;  %v1807_v51 = vld [vmem:[%s4410_s3 + $0x2f8] sm:$0xff] }
  0xfa   :  { %v3013_v41 = vpack.c.bf16 %v1803_v39, %v1802_v38  ;;  %v3016_v47 = vpack.c.bf16 %v1805_v45, %v1804_v44  ;;  %v3019_v56 = vpack.c.bf16 %v1807_v51, %v1806_v50  ;;  %v1824_v60 = vld [vmem:[%s4410_s3 + $0x380] sm:$0xff]  ;;  %v1825_v61 = vld [vmem:[%s4410_s3 + $0x388] sm:$0xff]  ;;  %v1826_v5 = vld [vmem:[%s4410_s3 + $0x390] sm:$0xff] }
  0xfb   :  { %2936 = vmatpush3.bf16.msra.mxu0 %v2935_v28  ;;  %v1784_v28 = vld [vmem:[%s4410_s3 + $0x240] sm:$0xff]  ;;  %v3046_v0 = vpack.c.bf16 %v1825_v61, %v1824_v60  ;;  %v1827_v7 = vld [vmem:[%s4410_s3 + $0x398] sm:$0xff]  ;;  %v1817_v23 = vld [vmem:[%s4410_s3 + $0x348] sm:$0xff] }
  0xfc   :  { %2960 = vmatpush3.bf16.msra.mxu1 %v2959_v31  ;;  %2937 = vmatprep.subr.bf16.mxu0 %v3294_v35  ;;  %v1785_v31 = vld [vmem:[%s4410_s3 + $0x248] sm:$0xff]  ;;  %v3049_v11 = vpack.c.bf16 %v1827_v7, %v1826_v5  ;;  %v1816_v21 = vld [vmem:[%s4410_s3 + $0x340] sm:$0xff]  ;;  %v1818_v26 = vld [vmem:[%s4410_s3 + $0x350] sm:$0xff] }
  0xfd   :  { %2961 = vmatprep.subr.bf16.mxu1 %v3294_v35  ;;  %v2986_v33 = vpack.c.bf16 %v1785_v31, %v1784_v28  ;;  %v3034_v28 = vpack.c.bf16 %v1817_v23, %v1816_v21  ;;  %v1819_v32 = vld [vmem:[%s4410_s3 + $0x358] sm:$0xff]  ;;  %v1820_v38 = vld [vmem:[%s4410_s3 + $0x360] sm:$0xff]  ;;  %v1821_v39 = vld [vmem:[%s4410_s3 + $0x368] sm:$0xff] }
  0xfe   :  { %v1822_v44 = vld [vmem:[%s4410_s3 + $0x370] sm:$0xff]  ;;  %v1823_v45 = vld [vmem:[%s4410_s3 + $0x378] sm:$0xff]  ;;  %v1840_v50 = vld [vmem:[%s4410_s3 + $0x400] sm:$0xff] }
  0xff   :  { %2939 = vmatpush3.bf16.msra.mxu0 %v2938_v36  ;;  %v1786_v36 = vld [vmem:[%s4410_s3 + $0x250] sm:$0xff]  ;;  %v1841_v51 = vld [vmem:[%s4410_s3 + $0x408] sm:$0xff]  ;;  %v1843_v61 = vld [vmem:[%s4410_s3 + $0x418] sm:$0xff] }
 0x100   :  { %2963 = vmatpush3.bf16.msra.mxu1 %v2962_v37  ;;  %2940 = vmatprep.subr.bf16.mxu0 %v3294_v35  ;;  %v1787_v37 = vld [vmem:[%s4410_s3 + $0x258] sm:$0xff]  ;;  %v1842_v60 = vld [vmem:[%s4410_s3 + $0x410] sm:$0xff]  ;;  %v1844_v5 = vld [vmem:[%s4410_s3 + $0x420] sm:$0xff] }
 0x101   :  { %2964 = vmatprep.subr.bf16.mxu1 %v3294_v35  ;;  %v2989_v40 = vpack.c.bf16 %v1787_v37, %v1786_v36  ;;  %v3037_v36 = vpack.c.bf16 %v1819_v32, %v1818_v26  ;;  %v1845_v7 = vld [vmem:[%s4410_s3 + $0x428] sm:$0xff]  ;;  %v1850_v21 = vld [vmem:[%s4410_s3 + $0x450] sm:$0xff]  ;;  %v1851_v23 = vld [vmem:[%s4410_s3 + $0x458] sm:$0xff] }
 0x102   :  { %v1852_v26 = vld [vmem:[%s4410_s3 + $0x460] sm:$0xff]  ;;  %v1853_v32 = vld [vmem:[%s4410_s3 + $0x468] sm:$0xff] }
 0x103   :  { %2942 = vmatpush3.bf16.msra.mxu0 %v2941_v42  ;;  %v1788_v42 = vld [vmem:[%s4410_s3 + $0x260] sm:$0xff] }
 0x104   :  { %2966 = vmatpush3.bf16.msra.mxu1 %v2965_v43  ;;  %2943 = vmatprep.subr.bf16.mxu0 %v3294_v35  ;;  %v1789_v43 = vld [vmem:[%s4410_s3 + $0x268] sm:$0xff] }
 0x105   :  { %2967 = vmatprep.subr.bf16.mxu1 %v3294_v35  ;;  %v2992_v46 = vpack.c.bf16 %v1789_v43, %v1788_v42  ;;  %v3040_v42 = vpack.c.bf16 %v1821_v39, %v1820_v38  ;;  %v1854_v38 = vld [vmem:[%s4410_s3 + $0x470] sm:$0xff]  ;;  %v1855_v39 = vld [vmem:[%s4410_s3 + $0x478] sm:$0xff] }
 0x107   :  { %2945 = vmatpush3.bf16.msra.mxu0 %v2944_v48  ;;  %v1790_v48 = vld [vmem:[%s4410_s3 + $0x270] sm:$0xff] }
 0x108   :  { %2969 = vmatpush3.bf16.msra.mxu1 %v2968_v49  ;;  %2946 = vmatprep.subr.bf16.mxu0 %v3294_v35  ;;  %v1791_v49 = vld [vmem:[%s4410_s3 + $0x278] sm:$0xff] }
 0x109   :  { %2970 = vmatprep.subr.bf16.mxu1 %v3294_v35  ;;  %v2995_v55 = vpack.c.bf16 %v1791_v49, %v1790_v48  ;;  %v3043_v48 = vpack.c.bf16 %v1823_v45, %v1822_v44  ;;  %v1872_v44 = vld [vmem:[%s4410_s3 + $0x500] sm:$0xff]  ;;  %v1873_v45 = vld [vmem:[%s4410_s3 + $0x508] sm:$0xff] }
 0x10b   :  { %2948 = vmatpush3.bf16.msra.mxu0 %v2947_v58  ;;  %v1808_v58 = vld [vmem:[%s4410_s3 + $0x300] sm:$0xff] }
 0x10c   :  { %2972 = vmatpush3.bf16.msra.mxu1 %v2971_v59  ;;  %2973 = vmatprep.subr.bf16.mxu0 %v3294_v35  ;;  %v1809_v59 = vld [vmem:[%s4410_s3 + $0x308] sm:$0xff] }
 0x10d   :  { %2997 = vmatprep.subr.bf16.mxu1 %v3294_v35  ;;  %v3022_v62 = vpack.c.bf16 %v1809_v59, %v1808_v58  ;;  %v3070_v58 = vpack.c.bf16 %v1841_v51, %v1840_v50  ;;  %v1874_v50 = vld [vmem:[%s4410_s3 + $0x510] sm:$0xff]  ;;  %v1875_v51 = vld [vmem:[%s4410_s3 + $0x518] sm:$0xff] }
 0x10e   :  { %2396 = vmatmul.mubr.f32.vlgmr.msra.gmra.mrb[4].mxu0 %v3537_v52  ;;  %v1796_v52 = vld [vmem:[%s4410_s3 + $0x2a0] sm:$0xff] }
 0x10f   :  { %2431 = vmatmul.mubr.f32.vlgmr.msra.gmra.mrb[4].mxu1 %v3540_v53  ;;  %2975 = vmatpush3.bf16.msra.mxu0 %v2974_v1  ;;  %v1797_v53 = vld [vmem:[%s4410_s3 + $0x2a8] sm:$0xff]  ;;  %v1810_v1 = vld [vmem:[%s4410_s3 + $0x310] sm:$0xff] }
 0x110   :  { %2999 = vmatpush3.bf16.msra.mxu1 %v2998_v4  ;;  %2976 = vmatprep.subr.bf16.mxu0 %v3294_v35  ;;  %v3004_v18 = vpack.c.bf16 %v1797_v53, %v1796_v52  ;;  %v1811_v4 = vld [vmem:[%s4410_s3 + $0x318] sm:$0xff]  ;;  %v1814_v52 = vld [vmem:[%s4410_s3 + $0x330] sm:$0xff] }
 0x111   :  { %3000 = vmatprep.subr.bf16.mxu1 %v3294_v35  ;;  %2465 = vmatprep.mubr.msk.f32.mxu0 %vm3295_vm1, %v3296_v10  ;;  %v3025_v8 = vpack.c.bf16 %v1811_v4, %v1810_v1  ;;  %v1815_v53 = vld [vmem:[%s4410_s3 + $0x338] sm:$0xff]  ;;  %v3073_v1 = vpack.c.bf16 %v1843_v61, %v1842_v60  ;;  %v1876_v60 = vld [vmem:[%s4410_s3 + $0x520] sm:$0xff]  ;;  %v1877_v61 = vld [vmem:[%s4410_s3 + $0x528] sm:$0xff] }
 0x112   :  { %2500 = vmatprep.mubr.msk.f32.mxu1 %vm3295_vm1, %v3296_v10  ;;  %v3031_v19 = vpack.c.bf16 %v1815_v53, %v1814_v52  ;;  %v1848_v52 = vld [vmem:[%s4410_s3 + $0x440] sm:$0xff]  ;;  %v1849_v53 = vld [vmem:[%s4410_s3 + $0x448] sm:$0xff] }
 0x113   :  { %2978 = vmatpush3.bf16.msra.mxu0 %v2977_v12  ;;  %v1812_v12 = vld [vmem:[%s4410_s3 + $0x320] sm:$0xff] }
 0x114   :  { %3002 = vmatpush3.bf16.msra.mxu1 %v3001_v13  ;;  %2979 = vmatprep.subr.bf16.mxu0 %v3294_v35  ;;  %v1813_v13 = vld [vmem:[%s4410_s3 + $0x328] sm:$0xff] }
 0x115   :  { %3003 = vmatprep.subr.bf16.mxu1 %v3294_v35  ;;  %v3028_v14 = vpack.c.bf16 %v1813_v13, %v1812_v12  ;;  %v1846_v12 = vld [vmem:[%s4410_s3 + $0x430] sm:$0xff]  ;;  %v1847_v13 = vld [vmem:[%s4410_s3 + $0x438] sm:$0xff] }
 0x117   :  { %2981 = vmatpush3.bf16.msra.mxu0 %v2980_v16  ;;  %v1830_v16 = vld [vmem:[%s4410_s3 + $0x3b0] sm:$0xff] }
 0x118   :  { %3005 = vmatpush3.bf16.msra.mxu1 %v3004_v18  ;;  %2982 = vmatprep.subr.bf16.mxu0 %v3294_v35  ;;  %v1831_v18 = vld [vmem:[%s4410_s3 + $0x3b8] sm:$0xff] }
 0x119   :  { %3006 = vmatprep.subr.bf16.mxu1 %v3294_v35  ;;  %v3055_v20 = vpack.c.bf16 %v1831_v18, %v1830_v16  ;;  %v1864_v16 = vld [vmem:[%s4410_s3 + $0x4c0] sm:$0xff]  ;;  %v1865_v18 = vld [vmem:[%s4410_s3 + $0x4c8] sm:$0xff] }
 0x11b   :  { %2984 = vmatpush3.bf16.msra.mxu0 %v2983_v24  ;;  %v1832_v24 = vld [vmem:[%s4410_s3 + $0x3c0] sm:$0xff] }
 0x11c   :  { %3008 = vmatpush3.bf16.msra.mxu1 %v3007_v25  ;;  %2985 = vmatprep.subr.bf16.mxu0 %v3294_v35  ;;  %v1833_v25 = vld [vmem:[%s4410_s3 + $0x3c8] sm:$0xff] }
 0x11d   :  { %3009 = vmatprep.subr.bf16.mxu1 %v3294_v35  ;;  %v3058_v31 = vpack.c.bf16 %v1833_v25, %v1832_v24  ;;  %v1866_v24 = vld [vmem:[%s4410_s3 + $0x4d0] sm:$0xff]  ;;  %v1867_v25 = vld [vmem:[%s4410_s3 + $0x4d8] sm:$0xff] }
 0x11f   :  { %2987 = vmatpush3.bf16.msra.mxu0 %v2986_v33  ;;  %v1834_v33 = vld [vmem:[%s4410_s3 + $0x3d0] sm:$0xff] }
 0x120   :  { %3011 = vmatpush3.bf16.msra.mxu1 %v3010_v34  ;;  %2988 = vmatprep.subr.bf16.mxu0 %v3294_v35  ;;  %v1835_v34 = vld [vmem:[%s4410_s3 + $0x3d8] sm:$0xff] }
 0x121   :  { %3012 = vmatprep.subr.bf16.mxu1 %v3294_v35  ;;  %v3061_v37 = vpack.c.bf16 %v1835_v34, %v1834_v33  ;;  %v1868_v33 = vld [vmem:[%s4410_s3 + $0x4e0] sm:$0xff]  ;;  %v1869_v34 = vld [vmem:[%s4410_s3 + $0x4e8] sm:$0xff] }
 0x123   :  { %2990 = vmatpush3.bf16.msra.mxu0 %v2989_v40  ;;  %v1836_v40 = vld [vmem:[%s4410_s3 + $0x3e0] sm:$0xff] }
 0x124   :  { %3014 = vmatpush3.bf16.msra.mxu1 %v3013_v41  ;;  %2991 = vmatprep.subr.bf16.mxu0 %v3294_v35  ;;  %v1837_v41 = vld [vmem:[%s4410_s3 + $0x3e8] sm:$0xff] }
 0x125   :  { %3015 = vmatprep.subr.bf16.mxu1 %v3294_v35  ;;  %v3064_v43 = vpack.c.bf16 %v1837_v41, %v1836_v40  ;;  %v1870_v40 = vld [vmem:[%s4410_s3 + $0x4f0] sm:$0xff]  ;;  %v1871_v41 = vld [vmem:[%s4410_s3 + $0x4f8] sm:$0xff] }
 0x127   :  { %2993 = vmatpush3.bf16.msra.mxu0 %v2992_v46  ;;  %v1838_v46 = vld [vmem:[%s4410_s3 + $0x3f0] sm:$0xff] }
 0x128   :  { %3017 = vmatpush3.bf16.msra.mxu1 %v3016_v47  ;;  %2994 = vmatprep.subr.bf16.mxu0 %v3294_v35  ;;  %v1839_v47 = vld [vmem:[%s4410_s3 + $0x3f8] sm:$0xff] }
 0x129   :  { %3018 = vmatprep.subr.bf16.mxu1 %v3294_v35  ;;  %v3067_v49 = vpack.c.bf16 %v1839_v47, %v1838_v46  ;;  %v1888_v46 = vld [vmem:[%s4410_s3 + $0x580] sm:$0xff]  ;;  %v1889_v47 = vld [vmem:[%s4410_s3 + $0x588] sm:$0xff] }
 0x12b   :  { %2996 = vmatpush3.bf16.msra.mxu0 %v2995_v55  ;;  %v1856_v55 = vld [vmem:[%s4410_s3 + $0x480] sm:$0xff] }
 0x12c   :  { %3020 = vmatpush3.bf16.msra.mxu1 %v3019_v56  ;;  %3021 = vmatprep.subr.bf16.mxu0 %v3294_v35  ;;  %v1857_v56 = vld [vmem:[%s4410_s3 + $0x488] sm:$0xff] }
 0x12d   :  { %3045 = vmatprep.subr.bf16.mxu1 %v3294_v35  ;;  %v3094_v59 = vpack.c.bf16 %v1857_v56, %v1856_v55  ;;  %v1890_v55 = vld [vmem:[%s4410_s3 + $0x590] sm:$0xff]  ;;  %v1891_v56 = vld [vmem:[%s4410_s3 + $0x598] sm:$0xff] }
 0x12e   :  { %2466 = vmatmul.mubr.f32.vlgmr.msra.gmra.mrb[6].mxu0 %v3543_v54  ;;  %v1828_v54 = vld [vmem:[%s4410_s3 + $0x3a0] sm:$0xff] }
 0x12f   :  { %2501 = vmatmul.mubr.f32.vlgmr.msra.gmra.mrb[6].mxu1 %v3552_v57  ;;  %3023 = vmatpush3.bf16.msra.mxu0 %v3022_v62  ;;  %v1829_v57 = vld [vmem:[%s4410_s3 + $0x3a8] sm:$0xff]  ;;  %v1858_v62 = vld [vmem:[%s4410_s3 + $0x490] sm:$0xff] }
 0x130   :  { %3047 = vmatpush3.bf16.msra.mxu1 %v3046_v0  ;;  %3024 = vmatprep.subr.bf16.mxu0 %v3294_v35  ;;  %v3052_v15 = vpack.c.bf16 %v1829_v57, %v1828_v54  ;;  %v1859_v0 = vld [vmem:[%s4410_s3 + $0x498] sm:$0xff]  ;;  %v1862_v54 = vld [vmem:[%s4410_s3 + $0x4b0] sm:$0xff] }
 0x131   :  { %3048 = vmatprep.subr.bf16.mxu1 %v3294_v35  ;;  %2535 = vmatprep.mubr.msk.f32.mxu0 %vm3295_vm1, %v3296_v10  ;;  %v3097_v4 = vpack.c.bf16 %v1859_v0, %v1858_v62  ;;  %v1863_v57 = vld [vmem:[%s4410_s3 + $0x4b8] sm:$0xff]  ;;  %v3124_v62 = vpack.c.bf16 %v1877_v61, %v1876_v60 }
 0x132   :  { %2570 = vmatprep.mubr.msk.f32.mxu1 %vm3295_vm1, %v3296_v10 }
 0x133   :  { %3026 = vmatpush3.bf16.msra.mxu0 %v3025_v8  ;;  %v3076_v8 = vpack.c.bf16 %v1845_v7, %v1844_v5  ;;  %v1894_v5 = vld [vmem:[%s4410_s3 + $0x5b0] sm:$0xff]  ;;  %v1895_v7 = vld [vmem:[%s4410_s3 + $0x5b8] sm:$0xff] }
 0x134   :  { %3050 = vmatpush3.bf16.msra.mxu1 %v3049_v11  ;;  %3027 = vmatprep.subr.bf16.mxu0 %v3294_v35 }
 0x135   :  { %3051 = vmatprep.subr.bf16.mxu1 %v3294_v35 }
 0x137   :  { %3029 = vmatpush3.bf16.msra.mxu0 %v3028_v14  ;;  %v3079_v14 = vpack.c.bf16 %v1847_v13, %v1846_v12  ;;  %v1896_v12 = vld [vmem:[%s4410_s3 + $0x5c0] sm:$0xff]  ;;  %v1897_v13 = vld [vmem:[%s4410_s3 + $0x5c8] sm:$0xff] }
 0x138   :  { %3053 = vmatpush3.bf16.msra.mxu1 %v3052_v15  ;;  %3030 = vmatprep.subr.bf16.mxu0 %v3294_v35  ;;  %v3103_v15 = vpack.c.bf16 %v1863_v57, %v1862_v54  ;;  %v3154_v57 = vpack.c.bf16 %v1897_v13, %v1896_v12  ;;  %v1916_v12 = vld [vmem:[%s4410_s3 + $0x660] sm:$0xff]  ;;  %v1917_v13 = vld [vmem:[%s4410_s3 + $0x668] sm:$0xff] }
 0x139   :  { %3054 = vmatprep.subr.bf16.mxu1 %v3294_v35 }
 0x13b   :  { %3032 = vmatpush3.bf16.msra.mxu0 %v3031_v19  ;;  %v3082_v19 = vpack.c.bf16 %v1849_v53, %v1848_v52  ;;  %v1898_v52 = vld [vmem:[%s4410_s3 + $0x5d0] sm:$0xff]  ;;  %v1899_v53 = vld [vmem:[%s4410_s3 + $0x5d8] sm:$0xff] }
 0x13c   :  { %3056 = vmatpush3.bf16.msra.mxu1 %v3055_v20  ;;  %3033 = vmatprep.subr.bf16.mxu0 %v3294_v35  ;;  %v3106_v20 = vpack.c.bf16 %v1865_v18, %v1864_v16  ;;  %v3157_v18 = vpack.c.bf16 %v1899_v53, %v1898_v52  ;;  %v1918_v52 = vld [vmem:[%s4410_s3 + $0x670] sm:$0xff]  ;;  %v1919_v53 = vld [vmem:[%s4410_s3 + $0x678] sm:$0xff] }
 0x13d   :  { %3057 = vmatprep.subr.bf16.mxu1 %v3294_v35 }
 0x13f   :  { %3035 = vmatpush3.bf16.msra.mxu0 %v3034_v28  ;;  %v3085_v28 = vpack.c.bf16 %v1851_v23, %v1850_v21  ;;  %v1900_v21 = vld [vmem:[%s4410_s3 + $0x5e0] sm:$0xff]  ;;  %v1901_v23 = vld [vmem:[%s4410_s3 + $0x5e8] sm:$0xff] }
 0x140   :  { %3059 = vmatpush3.bf16.msra.mxu1 %v3058_v31  ;;  %3036 = vmatprep.subr.bf16.mxu0 %v3294_v35  ;;  %v3109_v31 = vpack.c.bf16 %v1867_v25, %v1866_v24  ;;  %v3160_v25 = vpack.c.bf16 %v1901_v23, %v1900_v21  ;;  %v1936_v21 = vld [vmem:[%s4410_s3 + $0x700] sm:$0xff]  ;;  %v1937_v23 = vld [vmem:[%s4410_s3 + $0x708] sm:$0xff] }
 0x141   :  { %3060 = vmatprep.subr.bf16.mxu1 %v3294_v35 }
 0x143   :  { %3038 = vmatpush3.bf16.msra.mxu0 %v3037_v36  ;;  %v3088_v36 = vpack.c.bf16 %v1853_v32, %v1852_v26  ;;  %v1902_v26 = vld [vmem:[%s4410_s3 + $0x5f0] sm:$0xff]  ;;  %v1903_v32 = vld [vmem:[%s4410_s3 + $0x5f8] sm:$0xff] }
 0x144   :  { %3062 = vmatpush3.bf16.msra.mxu1 %v3061_v37  ;;  %3039 = vmatprep.subr.bf16.mxu0 %v3294_v35  ;;  %v3112_v37 = vpack.c.bf16 %v1869_v34, %v1868_v33  ;;  %v3163_v34 = vpack.c.bf16 %v1903_v32, %v1902_v26  ;;  %v1938_v26 = vld [vmem:[%s4410_s3 + $0x710] sm:$0xff]  ;;  %v1939_v32 = vld [vmem:[%s4410_s3 + $0x718] sm:$0xff] }
 0x145   :  { %3063 = vmatprep.subr.bf16.mxu1 %v3294_v35 }
 0x147   :  { %3041 = vmatpush3.bf16.msra.mxu0 %v3040_v42  ;;  %v3091_v42 = vpack.c.bf16 %v1855_v39, %v1854_v38  ;;  %v1920_v38 = vld [vmem:[%s4410_s3 + $0x680] sm:$0xff]  ;;  %v1921_v39 = vld [vmem:[%s4410_s3 + $0x688] sm:$0xff] }
 0x148   :  { %3065 = vmatpush3.bf16.msra.mxu1 %v3064_v43  ;;  %3042 = vmatprep.subr.bf16.mxu0 %v3294_v35  ;;  %v3115_v43 = vpack.c.bf16 %v1871_v41, %v1870_v40  ;;  %v3190_v41 = vpack.c.bf16 %v1921_v39, %v1920_v38  ;;  %v1940_v38 = vld [vmem:[%s4410_s3 + $0x720] sm:$0xff]  ;;  %v1941_v39 = vld [vmem:[%s4410_s3 + $0x728] sm:$0xff] }
 0x149   :  { %3066 = vmatprep.subr.bf16.mxu1 %v3294_v35 }
 0x14b   :  { %3044 = vmatpush3.bf16.msra.mxu0 %v3043_v48  ;;  %v3118_v48 = vpack.c.bf16 %v1873_v45, %v1872_v44  ;;  %v1922_v44 = vld [vmem:[%s4410_s3 + $0x690] sm:$0xff]  ;;  %v1923_v45 = vld [vmem:[%s4410_s3 + $0x698] sm:$0xff] }
 0x14c   :  { %3068 = vmatpush3.bf16.msra.mxu1 %v3067_v49  ;;  %3069 = vmatprep.subr.bf16.mxu0 %v3294_v35  ;;  %v3142_v49 = vpack.c.bf16 %v1889_v47, %v1888_v46  ;;  %v3193_v47 = vpack.c.bf16 %v1923_v45, %v1922_v44  ;;  %v1959_v44 = vld [vmem:[%s4410_s3 + $0x7b8] sm:$0xff] }
 0x14d   :  { %3093 = vmatprep.subr.bf16.mxu1 %v3294_v35 }
 0x14e   :  { %2536 = vmatmul.mubr.f32.vlgmr.msra.gmra.mrb[8].mxu0 %v3570_v2  ;;  %v1860_v2 = vld [vmem:[%s4410_s3 + $0x4a0] sm:$0xff] }
 0x14f   :  { %2571 = vmatmul.mubr.f32.vlgmr.msra.gmra.mrb[8].mxu1 %v3573_v3  ;;  %3071 = vmatpush3.bf16.msra.mxu0 %v3070_v58  ;;  %v1861_v3 = vld [vmem:[%s4410_s3 + $0x4a8] sm:$0xff]  ;;  %v3121_v58 = vpack.c.bf16 %v1875_v51, %v1874_v50 }
 0x150   :  { %3095 = vmatpush3.bf16.msra.mxu1 %v3094_v59  ;;  %3072 = vmatprep.subr.bf16.mxu0 %v3294_v35  ;;  %v3100_v11 = vpack.c.bf16 %v1861_v3, %v1860_v2  ;;  %v3145_v59 = vpack.c.bf16 %v1891_v56, %v1890_v55  ;;  %v3151_v3 = vpack.c.bf16 %v1895_v7, %v1894_v5  ;;  %v1910_v55 = vld [vmem:[%s4410_s3 + $0x630] sm:$0xff]  ;;  %v1911_v56 = vld [vmem:[%s4410_s3 + $0x638] sm:$0xff] }
 0x151   :  { %3096 = vmatprep.subr.bf16.mxu1 %v3294_v35  ;;  %2605 = vmatprep.mubr.msk.f32.mxu0 %vm3295_vm1, %v3296_v10  ;;  %v3175_v60 = vpack.c.bf16 %v1911_v56, %v1910_v55  ;;  %v1914_v5 = vld [vmem:[%s4410_s3 + $0x650] sm:$0xff]  ;;  %v1915_v7 = vld [vmem:[%s4410_s3 + $0x658] sm:$0xff] }
 0x152   :  { %2640 = vmatprep.mubr.msk.f32.mxu1 %vm3295_vm1, %v3296_v10  ;;  %v1947_v55 = vld [vmem:[%s4410_s3 + $0x758] sm:$0xff]  ;;  %v1962_v56 = vld [vmem:[%s4410_s3 + $0x7d0] sm:$0xff] }
 0x153   :  { %3074 = vmatpush3.bf16.msra.mxu0 %v3073_v1  ;;  %v1878_v1 = vld [vmem:[%s4410_s3 + $0x530] sm:$0xff] }
 0x154   :  { %3098 = vmatpush3.bf16.msra.mxu1 %v3097_v4  ;;  %3075 = vmatprep.subr.bf16.mxu0 %v3294_v35  ;;  %v1879_v4 = vld [vmem:[%s4410_s3 + $0x538] sm:$0xff] }
 0x155   :  { %3099 = vmatprep.subr.bf16.mxu1 %v3294_v35  ;;  %v3127_v2 = vpack.c.bf16 %v1879_v4, %v1878_v1 }
 0x157   :  { %3077 = vmatpush3.bf16.msra.mxu0 %v3076_v8  ;;  %v1880_v8 = vld [vmem:[%s4410_s3 + $0x540] sm:$0xff] }
 0x158   :  { %3101 = vmatpush3.bf16.msra.mxu1 %v3100_v11  ;;  %3078 = vmatprep.subr.bf16.mxu0 %v3294_v35  ;;  %v1881_v11 = vld [vmem:[%s4410_s3 + $0x548] sm:$0xff] }
 0x159   :  { %3102 = vmatprep.subr.bf16.mxu1 %v3294_v35  ;;  %v3130_v54 = vpack.c.bf16 %v1881_v11, %v1880_v8  ;;  %v3181_v8 = vpack.c.bf16 %v1915_v7, %v1914_v5 }
 0x15b   :  { %3080 = vmatpush3.bf16.msra.mxu0 %v3079_v14  ;;  %v1882_v14 = vld [vmem:[%s4410_s3 + $0x550] sm:$0xff] }
 0x15c   :  { %3104 = vmatpush3.bf16.msra.mxu1 %v3103_v15  ;;  %3081 = vmatprep.subr.bf16.mxu0 %v3294_v35  ;;  %v1883_v15 = vld [vmem:[%s4410_s3 + $0x558] sm:$0xff] }
 0x15d   :  { %3105 = vmatprep.subr.bf16.mxu1 %v3294_v35  ;;  %v3133_v16 = vpack.c.bf16 %v1883_v15, %v1882_v14  ;;  %v3184_v14 = vpack.c.bf16 %v1917_v13, %v1916_v12  ;;  %v1966_v12 = vld [vmem:[%s4410_s3 + $0x7f0] sm:$0xff]  ;;  %v1967_v13 = vld [vmem:[%s4410_s3 + $0x7f8] sm:$0xff] }
 0x15f   :  { %3083 = vmatpush3.bf16.msra.mxu0 %v3082_v19  ;;  %v1884_v19 = vld [vmem:[%s4410_s3 + $0x560] sm:$0xff] }
 0x160   :  { %3107 = vmatpush3.bf16.msra.mxu1 %v3106_v20  ;;  %3084 = vmatprep.subr.bf16.mxu0 %v3294_v35  ;;  %v1885_v20 = vld [vmem:[%s4410_s3 + $0x568] sm:$0xff] }
 0x161   :  { %3108 = vmatprep.subr.bf16.mxu1 %v3294_v35  ;;  %v3136_v24 = vpack.c.bf16 %v1885_v20, %v1884_v19  ;;  %v3187_v19 = vpack.c.bf16 %v1919_v53, %v1918_v52 }
 0x163   :  { %3086 = vmatpush3.bf16.msra.mxu0 %v3085_v28  ;;  %v1886_v28 = vld [vmem:[%s4410_s3 + $0x570] sm:$0xff] }
 0x164   :  { %3110 = vmatpush3.bf16.msra.mxu1 %v3109_v31  ;;  %3087 = vmatprep.subr.bf16.mxu0 %v3294_v35  ;;  %v1887_v31 = vld [vmem:[%s4410_s3 + $0x578] sm:$0xff] }
 0x165   :  { %3111 = vmatprep.subr.bf16.mxu1 %v3294_v35  ;;  %v3139_v33 = vpack.c.bf16 %v1887_v31, %v1886_v28  ;;  %v3214_v28 = vpack.c.bf16 %v1937_v23, %v1936_v21 }
 0x167   :  { %3089 = vmatpush3.bf16.msra.mxu0 %v3088_v36  ;;  %v1904_v36 = vld [vmem:[%s4410_s3 + $0x600] sm:$0xff] }
 0x168   :  { %3113 = vmatpush3.bf16.msra.mxu1 %v3112_v37  ;;  %3090 = vmatprep.subr.bf16.mxu0 %v3294_v35  ;;  %v1905_v37 = vld [vmem:[%s4410_s3 + $0x608] sm:$0xff] }
 0x169   :  { %3114 = vmatprep.subr.bf16.mxu1 %v3294_v35  ;;  %v3166_v40 = vpack.c.bf16 %v1905_v37, %v1904_v36  ;;  %v3217_v36 = vpack.c.bf16 %v1939_v32, %v1938_v26 }
 0x16b   :  { %3092 = vmatpush3.bf16.msra.mxu0 %v3091_v42  ;;  %v1906_v42 = vld [vmem:[%s4410_s3 + $0x610] sm:$0xff] }
 0x16c   :  { %3116 = vmatpush3.bf16.msra.mxu1 %v3115_v43  ;;  %3117 = vmatprep.subr.bf16.mxu0 %v3294_v35  ;;  %v1907_v43 = vld [vmem:[%s4410_s3 + $0x618] sm:$0xff] }
 0x16d   :  { %3141 = vmatprep.subr.bf16.mxu1 %v3294_v35  ;;  %v3169_v46 = vpack.c.bf16 %v1907_v43, %v1906_v42  ;;  %v1942_v42 = vld [vmem:[%s4410_s3 + $0x730] sm:$0xff]  ;;  %v1943_v43 = vld [vmem:[%s4410_s3 + $0x738] sm:$0xff] }
 0x16e   :  { %2606 = vmatmul.mubr.f32.vlgmr.msra.gmra.mrb[10].mxu0 %v3580_v6  ;;  %v1893_v6 = vld [vmem:[%s4410_s3 + $0x5a8] sm:$0xff]  ;;  %v3223_v45 = vpack.c.bf16 %v1943_v43, %v1942_v42 }
 0x16f   :  { %2641 = vmatmul.mubr.f32.vlgmr.msra.gmra.mrb[10].mxu1 %v3558_v63  ;;  %3119 = vmatpush3.bf16.msra.mxu0 %v3118_v48  ;;  %v1892_v63 = vld [vmem:[%s4410_s3 + $0x5a0] sm:$0xff] }
 0x170   :  { %3143 = vmatpush3.bf16.msra.mxu1 %v3142_v49  ;;  %3120 = vmatprep.subr.bf16.mxu0 %v3294_v35  ;;  %v3148_v0 = vpack.c.bf16 %v1893_v6, %v1892_v63  ;;  %v1908_v48 = vld [vmem:[%s4410_s3 + $0x620] sm:$0xff]  ;;  %v1909_v49 = vld [vmem:[%s4410_s3 + $0x628] sm:$0xff] }
 0x171   :  { %3144 = vmatprep.subr.bf16.mxu1 %v3294_v35  ;;  %2675 = vmatprep.mubr.msk.f32.mxu0 %vm3295_vm1, %v3296_v10  ;;  %v3172_v50 = vpack.c.bf16 %v1909_v49, %v1908_v48  ;;  %v1912_v63 = vld [vmem:[%s4410_s3 + $0x640] sm:$0xff]  ;;  %v1913_v6 = vld [vmem:[%s4410_s3 + $0x648] sm:$0xff] }
 0x172   :  { %2710 = vmatprep.mubr.msk.f32.mxu1 %vm3295_vm1, %v3296_v10  ;;  %v3178_v1 = vpack.c.bf16 %v1913_v6, %v1912_v63  ;;  %v1945_v48 = vld [vmem:[%s4410_s3 + $0x748] sm:$0xff]  ;;  %v1960_v49 = vld [vmem:[%s4410_s3 + $0x7c0] sm:$0xff] }
 0x173   :  { %3122 = vmatpush3.bf16.msra.mxu0 %v3121_v58  ;;  %v1926_v58 = vld [vmem:[%s4410_s3 + $0x6b0] sm:$0xff]  ;;  %v1949_v63 = vld [vmem:[%s4410_s3 + $0x768] sm:$0xff] }
 0x174   :  { %3146 = vmatpush3.bf16.msra.mxu1 %v3145_v59  ;;  %3123 = vmatprep.subr.bf16.mxu0 %v3294_v35  ;;  %v1927_v59 = vld [vmem:[%s4410_s3 + $0x6b8] sm:$0xff] }
 0x175   :  { %3147 = vmatprep.subr.bf16.mxu1 %v3294_v35  ;;  %v3199_v61 = vpack.c.bf16 %v1927_v59, %v1926_v58  ;;  %v1963_v58 = vld [vmem:[%s4410_s3 + $0x7d8] sm:$0xff] }
 0x177   :  { %3125 = vmatpush3.bf16.msra.mxu0 %v3124_v62  ;;  %v1928_v62 = vld [vmem:[%s4410_s3 + $0x6c0] sm:$0xff] }
 0x178   :  { %3149 = vmatpush3.bf16.msra.mxu1 %v3148_v0  ;;  %3126 = vmatprep.subr.bf16.mxu0 %v3294_v35  ;;  %v1929_v0 = vld [vmem:[%s4410_s3 + $0x6c8] sm:$0xff] }
 0x179   :  { %3150 = vmatprep.subr.bf16.mxu1 %v3294_v35  ;;  %v3202_v4 = vpack.c.bf16 %v1929_v0, %v1928_v62  ;;  %v1964_v62 = vld [vmem:[%s4410_s3 + $0x7e0] sm:$0xff]  ;;  %v1965_v0 = vld [vmem:[%s4410_s3 + $0x7e8] sm:$0xff] }
 0x17b   :  { %3128 = vmatpush3.bf16.msra.mxu0 %v3127_v2  ;;  %v1930_v2 = vld [vmem:[%s4410_s3 + $0x6d0] sm:$0xff] }
 0x17c   :  { %3152 = vmatpush3.bf16.msra.mxu1 %v3151_v3  ;;  %3129 = vmatprep.subr.bf16.mxu0 %v3294_v35  ;;  %v1931_v3 = vld [vmem:[%s4410_s3 + $0x6d8] sm:$0xff] }
 0x17d   :  { %3153 = vmatprep.subr.bf16.mxu1 %v3294_v35  ;;  %v3205_v11 = vpack.c.bf16 %v1931_v3, %v1930_v2  ;;  %v3256_v3 = vpack.c.bf16 %v1965_v0, %v1964_v62 }
 0x17f   :  { %3131 = vmatpush3.bf16.msra.mxu0 %v3130_v54  ;;  %v1932_v54 = vld [vmem:[%s4410_s3 + $0x6e0] sm:$0xff] }
 0x180   :  { %3155 = vmatpush3.bf16.msra.mxu1 %v3154_v57  ;;  %3132 = vmatprep.subr.bf16.mxu0 %v3294_v35  ;;  %v1933_v57 = vld [vmem:[%s4410_s3 + $0x6e8] sm:$0xff] }
 0x181   :  { %3156 = vmatprep.subr.bf16.mxu1 %v3294_v35  ;;  %v3208_v15 = vpack.c.bf16 %v1933_v57, %v1932_v54  ;;  %v3259_v57 = vpack.c.bf16 %v1967_v13, %v1966_v12 }
 0x183   :  { %3134 = vmatpush3.bf16.msra.mxu0 %v3133_v16  ;;  %v1934_v16 = vld [vmem:[%s4410_s3 + $0x6f0] sm:$0xff] }
 0x184   :  { %3158 = vmatpush3.bf16.msra.mxu1 %v3157_v18  ;;  %3135 = vmatprep.subr.bf16.mxu0 %v3294_v35  ;;  %v1935_v18 = vld [vmem:[%s4410_s3 + $0x6f8] sm:$0xff] }
 0x185   :  { %3159 = vmatprep.subr.bf16.mxu1 %v3294_v35  ;;  %v3211_v20 = vpack.c.bf16 %v1935_v18, %v1934_v16 }
 0x187   :  { %3137 = vmatpush3.bf16.msra.mxu0 %v3136_v24  ;;  %v1952_v24 = vld [vmem:[%s4410_s3 + $0x780] sm:$0xff] }
 0x188   :  { %3161 = vmatpush3.bf16.msra.mxu1 %v3160_v25  ;;  %3138 = vmatprep.subr.bf16.mxu0 %v3294_v35  ;;  %v1953_v25 = vld [vmem:[%s4410_s3 + $0x788] sm:$0xff] }
 0x189   :  { %3162 = vmatprep.subr.bf16.mxu1 %v3294_v35  ;;  %v3238_v31 = vpack.c.bf16 %v1953_v25, %v1952_v24 }
 0x18b   :  { %3140 = vmatpush3.bf16.msra.mxu0 %v3139_v33  ;;  %v1954_v33 = vld [vmem:[%s4410_s3 + $0x790] sm:$0xff] }
 0x18c   :  { %3164 = vmatpush3.bf16.msra.mxu1 %v3163_v34  ;;  %3165 = vmatprep.subr.bf16.mxu0 %v3294_v35  ;;  %v1955_v34 = vld [vmem:[%s4410_s3 + $0x798] sm:$0xff] }
 0x18d   :  { %3189 = vmatprep.subr.bf16.mxu1 %v3294_v35  ;;  %v3241_v37 = vpack.c.bf16 %v1955_v34, %v1954_v33 }
 0x18e   :  { %2676 = vmatmul.mubr.f32.vlgmr.msra.gmra.mrb[12].mxu0 %v3585_v9  ;;  %v1924_v9 = vld [vmem:[%s4410_s3 + $0x6a0] sm:$0xff] }
 0x18f   :  { %2711 = vmatmul.mubr.f32.vlgmr.msra.gmra.mrb[12].mxu1 %v3598_v17  ;;  %3167 = vmatpush3.bf16.msra.mxu0 %v3166_v40  ;;  %v1925_v17 = vld [vmem:[%s4410_s3 + $0x6a8] sm:$0xff]  ;;  %v3220_v40 = vpack.c.bf16 %v1941_v39, %v1940_v38 }
 0x190   :  { %3191 = vmatpush3.bf16.msra.mxu1 %v3190_v41  ;;  %3168 = vmatprep.subr.bf16.mxu0 %v3294_v35  ;;  %v3196_v51 = vpack.c.bf16 %v1925_v17, %v1924_v9  ;;  %v1961_v9 = vld [vmem:[%s4410_s3 + $0x7c8] sm:$0xff] }
 0x191   :  { %3192 = vmatprep.subr.bf16.mxu1 %v3294_v35  ;;  %2745 = vmatprep.mubr.msk.f32.mxu0 %vm3295_vm1, %v3296_v10 }
 0x192   :  { %2780 = vmatprep.mubr.msk.f32.mxu1 %vm3295_vm1, %v3296_v10 }
 0x193   :  { %3170 = vmatpush3.bf16.msra.mxu0 %v3169_v46 }
 0x194   :  { %3194 = vmatpush3.bf16.msra.mxu1 %v3193_v47  ;;  %3171 = vmatprep.subr.bf16.mxu0 %v3294_v35  ;;  %v1944_v47 = vld [vmem:[%s4410_s3 + $0x740] sm:$0xff] }
 0x195   :  { %3195 = vmatprep.subr.bf16.mxu1 %v3294_v35  ;;  %v3226_v17 = vpack.c.bf16 %v1945_v48, %v1944_v47 }
 0x197   :  { %3173 = vmatpush3.bf16.msra.mxu0 %v3172_v50  ;;  %v3250_v50 = vpack.c.bf16 %v1961_v9, %v1960_v49 }
 0x198   :  { %3197 = vmatpush3.bf16.msra.mxu1 %v3196_v51  ;;  %3174 = vmatprep.subr.bf16.mxu0 %v3294_v35  ;;  %v1946_v51 = vld [vmem:[%s4410_s3 + $0x750] sm:$0xff] }
 0x199   :  { %3198 = vmatprep.subr.bf16.mxu1 %v3294_v35  ;;  %v3229_v59 = vpack.c.bf16 %v1947_v55, %v1946_v51 }
 0x19b   :  { %3176 = vmatpush3.bf16.msra.mxu0 %v3175_v60  ;;  %v3253_v60 = vpack.c.bf16 %v1963_v58, %v1962_v56 }
 0x19c   :  { %3200 = vmatpush3.bf16.msra.mxu1 %v3199_v61  ;;  %3177 = vmatprep.subr.bf16.mxu0 %v3294_v35  ;;  %v1948_v61 = vld [vmem:[%s4410_s3 + $0x760] sm:$0xff] }
 0x19d   :  { %3201 = vmatprep.subr.bf16.mxu1 %v3294_v35  ;;  %v3232_v2 = vpack.c.bf16 %v1949_v63, %v1948_v61 }
 0x19f   :  { %3179 = vmatpush3.bf16.msra.mxu0 %v3178_v1 }
 0x1a0   :  { %3203 = vmatpush3.bf16.msra.mxu1 %v3202_v4  ;;  %3180 = vmatprep.subr.bf16.mxu0 %v3294_v35 }
 0x1a1   :  { %3204 = vmatprep.subr.bf16.mxu1 %v3294_v35 }
 0x1a3   :  { %3182 = vmatpush3.bf16.msra.mxu0 %v3181_v8  ;;  %v1950_v8 = vld [vmem:[%s4410_s3 + $0x770] sm:$0xff] }
 0x1a4   :  { %3206 = vmatpush3.bf16.msra.mxu1 %v3205_v11  ;;  %3183 = vmatprep.subr.bf16.mxu0 %v3294_v35  ;;  %v1951_v11 = vld [vmem:[%s4410_s3 + $0x778] sm:$0xff] }
 0x1a5   :  { %3207 = vmatprep.subr.bf16.mxu1 %v3294_v35  ;;  %v3235_v54 = vpack.c.bf16 %v1951_v11, %v1950_v8 }
 0x1a7   :  { %3185 = vmatpush3.bf16.msra.mxu0 %v3184_v14 }
 0x1a8   :  { %3209 = vmatpush3.bf16.msra.mxu1 %v3208_v15  ;;  %3186 = vmatprep.subr.bf16.mxu0 %v3294_v35 }
 0x1a9   :  { %3210 = vmatprep.subr.bf16.mxu1 %v3294_v35 }
 0x1ab   :  { %3188 = vmatpush3.bf16.msra.mxu0 %v3187_v19 }
 0x1ac   :  { %3212 = vmatpush3.bf16.msra.mxu1 %v3211_v20  ;;  %3213 = vmatprep.subr.bf16.mxu0 %v3294_v35 }
 0x1ad   :  { %3237 = vmatprep.subr.bf16.mxu1 %v3294_v35 }
 0x1ae   :  { %2746 = vmatmul.mubr.f32.vlgmr.msra.gmra.mrb[14].mxu0 %v3610_v22  ;;  %v1956_v22 = vld [vmem:[%s4410_s3 + $0x7a0] sm:$0xff] }
 0x1af   :  { %2781 = vmatmul.mubr.f32.vlgmr.msra.gmra.mrb[14].mxu1 %v3616_v27  ;;  %3215 = vmatpush3.bf16.msra.mxu0 %v3214_v28  ;;  %v1957_v27 = vld [vmem:[%s4410_s3 + $0x7a8] sm:$0xff] }
 0x1b0   :  { %3239 = vmatpush3.bf16.msra.mxu1 %v3238_v31  ;;  %3216 = vmatprep.subr.bf16.mxu0 %v3294_v35  ;;  %v3244_v41 = vpack.c.bf16 %v1957_v27, %v1956_v22 }
 0x1b1   :  { %3240 = vmatprep.subr.bf16.mxu1 %v3294_v35  ;;  %2815 = vmatprep.mubr.msk.f32.mxu0 %vm3295_vm1, %v3296_v10 }
 0x1b2   :  { %2850 = vmatprep.mubr.msk.f32.mxu1 %vm3295_vm1, %v3296_v10  ;;  %v1958_v10 = vld [vmem:[%s4410_s3 + $0x7b0] sm:$0xff] }
 0x1b3   :  { %3218 = vmatpush3.bf16.msra.mxu0 %v3217_v36  ;;  %v3247_v46 = vpack.c.bf16 %v1959_v44, %v1958_v10 }
 0x1b4   :  { %3242 = vmatpush3.bf16.msra.mxu1 %v3241_v37  ;;  %3219 = vmatprep.subr.bf16.mxu0 %v3294_v35 }
 0x1b5   :  { %3243 = vmatprep.subr.bf16.mxu1 %v3294_v35 }
 0x1b7   :  { %3221 = vmatpush3.bf16.msra.mxu0 %v3220_v40 }
 0x1b8   :  { %3245 = vmatpush3.bf16.msra.mxu1 %v3244_v41  ;;  %3222 = vmatprep.subr.bf16.mxu0 %v3294_v35 }
 0x1b9   :  { %3246 = vmatprep.subr.bf16.mxu1 %v3294_v35 }
 0x1bb   :  { %3224 = vmatpush3.bf16.msra.mxu0 %v3223_v45 }
 0x1bc   :  { %3248 = vmatpush3.bf16.msra.mxu1 %v3247_v46  ;;  %3225 = vmatprep.subr.bf16.mxu0 %v3294_v35 }
 0x1bd   :  { %3249 = vmatprep.subr.bf16.mxu1 %v3294_v35 }
 0x1bf   :  { %3227 = vmatpush3.bf16.msra.mxu0 %v3226_v17 }
 0x1c0   :  { %3251 = vmatpush3.bf16.msra.mxu1 %v3250_v50  ;;  %3228 = vmatprep.subr.bf16.mxu0 %v3294_v35  ;;  %v1968_v50 = vld [vmem:[%s4411_s4] ss:$0 sm:$0xff] }
 0x1c1   :  { %v319_v6 = vpop.f32.mrb[2].mxu0  ;;  %3252 = vmatprep.subr.bf16.mxu1 %v3294_v35 }
 0x1c2   :  { %v389_v1 = vpop.f32.mrb[2].mxu1  ;;  %v2327_v4 = vpop.f32.mrb[3].mxu0 }
 0x1c3   :  { %v390_v5 = vadd.f32 %v389_v1, %v319_v6  ;;  %v2362_v7 = vpop.f32.mrb[3].mxu1  ;;  %3230 = vmatpush3.bf16.msra.mxu0 %v3229_v59 }
 0x1c4   :  { %3254 = vmatpush3.bf16.msra.mxu1 %v3253_v60  ;;  %3231 = vmatprep.subr.bf16.mxu0 %v3294_v35 }
 0x1c5   :  { %3255 = vmatprep.subr.bf16.mxu1 %v3294_v35 }
 0x1c7   :  { %3233 = vmatpush3.bf16.msra.mxu0 %v3232_v2 }
 0x1c8   :  { %3257 = vmatpush3.bf16.msra.mxu1 %v3256_v3  ;;  %3234 = vmatprep.subr.bf16.mxu0 %v3294_v35 }
 0x1c9   :  { %3258 = vmatprep.subr.bf16.mxu1 %v3294_v35 }
 0x1cb   :  { %3236 = vmatpush3.bf16.msra.mxu0 %v3235_v54 }
 0x1cc   :  { %3260 = vmatpush3.bf16.msra.mxu1 %v3259_v57 }
 0x1ce   :  { %2816 = vmatmul.mubr.f32.vlgmr.msra.gmra.mrb[16].mxu0 %v3619_v29 }
 0x1cf   :  { %2851 = vmatmul.mubr.f32.vlgmr.msra.gmra.mrb[16].mxu1 %v3622_v30 }
 0x1e1   :  { %v481_v14 = vpop.f32.mrb[4].mxu0 }
 0x1e2   :  { %v485_v15 = vadd.f32 %v481_v14, %v390_v5  ;;  %v574_v52 = vpop.f32.mrb[4].mxu1  ;;  %v2397_v53 = vpop.f32.mrb[5].mxu0 }
 0x1e3   :  { %v2432_v16 = vpop.f32.mrb[5].mxu1 }
 0x1e4   :  { %v578_v18 = vadd.f32 %v574_v52, %v485_v15 }
 0x201   :  { %v667_v19 = vpop.f32.mrb[6].mxu0 }
 0x202   :  { %v671_v20 = vadd.f32 %v667_v19, %v578_v18  ;;  %v760_v21 = vpop.f32.mrb[6].mxu1  ;;  %v2467_v23 = vpop.f32.mrb[7].mxu0 }
 0x203   :  { %v2502_v24 = vpop.f32.mrb[7].mxu1 }
 0x204   :  { %v764_v25 = vadd.f32 %v760_v21, %v671_v20 }
 0x221   :  { %v853_v28 = vpop.f32.mrb[8].mxu0 }
 0x222   :  { %v857_v35 = vadd.f32 %v853_v28, %v764_v25  ;;  %v946_v31 = vpop.f32.mrb[8].mxu1  ;;  %v2537_v26 = vpop.f32.mrb[9].mxu0 }
 0x223   :  { %v2572_v32 = vpop.f32.mrb[9].mxu1 }
 0x224   :  { %v950_v29 = vadd.f32 %v946_v31, %v857_v35 }
 0x241   :  { %v1038_v33 = vpop.f32.mrb[10].mxu0 }
 0x242   :  { %v1042_v30 = vadd.f32 %v1038_v33, %v950_v29  ;;  %v1130_v34 = vpop.f32.mrb[10].mxu1  ;;  %v2607_v36 = vpop.f32.mrb[11].mxu0 }
 0x243   :  { %v2642_v37 = vpop.f32.mrb[11].mxu1 }
 0x244   :  { %v1134_v38 = vadd.f32 %v1130_v34, %v1042_v30 }
 0x261   :  { %v1223_v39 = vpop.f32.mrb[12].mxu0 }
 0x262   :  { %v1227_v22 = vadd.f32 %v1223_v39, %v1134_v38  ;;  %v1316_v27 = vpop.f32.mrb[12].mxu1  ;;  %v2677_v40 = vpop.f32.mrb[13].mxu0 }
 0x263   :  { %v2712_v41 = vpop.f32.mrb[13].mxu1 }
 0x264   :  { %v1320_v42 = vadd.f32 %v1316_v27, %v1227_v22 }
 0x281   :  { %v1409_v43 = vpop.f32.mrb[14].mxu0 }
 0x282   :  { %v1413_v10 = vadd.f32 %v1409_v43, %v1320_v42  ;;  %v1502_v44 = vpop.f32.mrb[14].mxu1  ;;  %v2747_v45 = vpop.f32.mrb[15].mxu0 }
 0x283   :  { %v2782_v46 = vpop.f32.mrb[15].mxu1 }
 0x284   :  { %v1506_v47 = vadd.f32 %v1502_v44, %v1413_v10 }
 0x2a1   :  { %v1595_v48 = vpop.f32.mrb[16].mxu0 }
 0x2a2   :  { %v1599_v49 = vadd.f32 %v1595_v48, %v1506_v47  ;;  %v1688_v9 = vpop.f32.mrb[16].mxu1  ;;  %v2817_v17 = vpop.f32.mrb[17].mxu0 }
 0x2a3   :  { %v2852_v51 = vpop.f32.mrb[17].mxu1 }
 0x2a4   :  { %v1692_v55 = vadd.f32 %v1688_v9, %v1599_v49 }
 0x2a6   :  { %v1700_v56 = vadd.f32 %v1968_v50, %v1692_v55 }
 0x2a8   :  { %3267 = vtanh.f32 %v1700_v56 }
 0x2b2   :  { %v3268_v58 = vpop.eup %3267 }
 0x2b3   :  { %1702 = vst [vmem:[#allocation2] sm:$0x3] %v3268_v58 }
 0x2b4   :  { %3280 = shalt.err (!%p3277_p4)
}
 0x2b5   :  { %s3281_s4 = scalar_lea.hbm %s4412_s5, 32 }
 0x2b6   :  { %p3282_p5 = scmp.ne.s32.totalorder %s4412_s5, %s3281_s4  ;;  %p3285_p6 = scmp.lt.u32.totalorder %s3281_s4, %s4412_s5 }
 0x2b8   :  { %p3287_p7 = pnand %p3285_p6, %p3282_p5 }
 0x2ba   :  { %3290 = shalt.err (!%p3287_p7)
}
 0x2bb   :  { %1712 = dma.vmem_to_hbm [thread:$0]  %s1710_s12, 32, %s4412_s5, [#allocation3]  }
 0x2bc   :  { %3291 = dma.done.wait [#allocation3], 32  }
 0x2bd   :  { %3292 = vsyncadd [#allocation3], 4294967264 }
 0x2be   :  { %1716 = vsyncpa [#allocation3], 1 }

</bundles_post_ra>
